<compile_context>
chip_gen: v6e
topology: v6e:2x2x1
jax: 0.10.0
libtpu: 0.0.40
codegen_flags: <defaults>
</compile_context>

<pallas_src>
import math

import jax
import jax.numpy as jnp
from jax.experimental import pallas as pl
from jax.experimental.pallas import tpu as pltpu

ALPHA = 0.2            # LeakyReLU negative slope (module's `alpha`)
EPS = 9e-15            # matches torch.Tensor([9e-15])
NEG_BIG = -3.0e38      # finite "-inf" for masked max
LANES = 128


def _make_gat_kernel(fout: int):
    """Row-tile x col-tile fused GAT aggregation (online per-row softmax over neighbors)."""

    def kernel(ssrc_ref, sdst_ref, adj_ref, h_ref, out_ref, m_scr, acc_scr):
        k = pl.program_id(1)

        @pl.when(k == 0)
        def _():
            m_scr[...] = jnp.full_like(m_scr, NEG_BIG)
            acc_scr[...] = jnp.zeros_like(acc_scr)

        # e[i, j] = leakyrelu(s_src[i] + s_dst[j]) on this (TM, TK) block.
        e = ssrc_ref[...] + sdst_ref[...]                       # (TM,1)+(1,TK) -> (TM,TK)
        e = jnp.where(e > 0.0, e, ALPHA * e)
        mask = adj_ref[...] != 0                                # int8 -> bool, no i32 widen

        # Online per-row max update + rescale of the running accumulator.
        m_prev = m_scr[...]                                     # (TM, 1)
        m_blk = jnp.max(jnp.where(mask, e, NEG_BIG), axis=1, keepdims=True)
        m_new = jnp.maximum(m_prev, m_blk)
        scale = jnp.exp(m_prev - m_new)                         # 1.0 when the max is unchanged

        # Clamped exp keeps masked entries / empty rows finite; mask-multiply zeroes them.
        p = mask.astype(jnp.float32) * jnp.exp(jnp.minimum(e - m_new, 0.0))

        # (TM,TK) @ (TK,Fp) on the MXU, f32 accumulation; h's ones-column carries rowsum.
        acc_scr[...] = scale * acc_scr[...] + jnp.dot(
            p.astype(h_ref.dtype), h_ref[...], preferred_element_type=jnp.float32)
        m_scr[...] = m_new

        @pl.when(k == pl.num_programs(1) - 1)
        def _():
            acc = acc_scr[...]
            rowsum = acc[:, fout:fout + 1]          # ones-column of h -> rowsum for free
            h_prime = acc / (rowsum + EPS)
            # ELU with clamped exp argument (no transient inf for large positives)
            out_ref[...] = jnp.where(h_prime > 0.0, h_prime,
                                     jnp.exp(jnp.minimum(h_prime, 0.0)) - 1.0)

    return kernel


def sp_graph_attention_layer(x, adj_mask, W, bias, a, *, row_tile=256, col_tile=512,
                             agg_dtype=jnp.bfloat16):
    """x: (N, Fin) f32, adj_mask: (N, N) 0/1 mask (any dtype; streamed as int8),
    W: (Fin, Fout), bias: (1, Fout), a: (1, 2*Fout).  Returns (N, Fout) f32."""
    N, Fin = x.shape
    Fout = W.shape[1]
    # Lane-dense (padded) feature dim; at least one spare column reserved for the
    # ones-column that produces the row sum on the MXU.
    Fp = LANES * pl.cdiv(Fout + 1, LANES)

    tm = min(row_tile, N)
    tk = min(col_tile, N)
    assert N % tm == 0 and N % tk == 0 and tm % 8 == 0 and tk % LANES == 0, (
        "N must be a multiple of the row/col tiles (row tile mult of 8, col tile mult of 128)")
    # TODO(synk): arbitrary N needs padding/masking of the last partial tiles.

    # int8 mask stream: 4x less HBM/VMEM than f32 on the dominant N^2 array.
    if adj_mask.dtype != jnp.int8:
        adj_mask = (adj_mask != 0).astype(jnp.int8)

    # ---- tiny O(N*Fin*Fout) prep in plain XLA (would waste the MXU in-kernel) ------
    x = x.astype(jnp.float32)
    Wf = W.astype(jnp.float32)
    bf = bias.astype(jnp.float32)

    W_p = jnp.pad(Wf, ((0, 0), (0, Fp - Fout)))
    b_p = jnp.pad(bf, ((0, 0), (0, Fp - Fout)))
    b_p = b_p.at[0, Fout].set(1.0)                 # ones column -> rowsum via the MXU
    h = (x @ W_p + b_p).astype(agg_dtype)          # (N, Fp) lane-dense, bf16 by default

    # Per-node attention scores from x directly:  a_l.h_i = x_i.(W a_l) + b.a_l
    # (keeps skinny (Fout,1) matvecs off the kernel; s_dst already in (1,N) lane layout)
    a_l = a[:, :Fout].astype(jnp.float32)
    a_r = a[:, Fout:].astype(jnp.float32)
    s_src = x @ (Wf @ a_l.T) + bf @ a_l.T                      # (N, 1)
    s_dst = (x @ (Wf @ a_r.T) + bf @ a_r.T).reshape(1, N)      # (1, N)

    grid = (N // tm, N // tk)
    out = pl.pallas_call(
        _make_gat_kernel(Fout),
        grid=grid,
        out_shape=jax.ShapeDtypeStruct((N, Fp), jnp.float32),
        in_specs=[
            pl.BlockSpec((tm, 1), lambda i, k: (i, 0)),     # s_src  (row scores)
            pl.BlockSpec((1, tk), lambda i, k: (0, k)),     # s_dst  (neighbor scores)
            pl.BlockSpec((tm, tk), lambda i, k: (i, k)),    # adj    (int8, single pass)
            pl.BlockSpec((tk, Fp), lambda i, k: (k, 0)),    # h      (agg_dtype, lane-dense)
        ],
        out_specs=pl.BlockSpec((tm, Fp), lambda i, k: (i, 0)),   # resident over k, lane-dense
        scratch_shapes=[
            pltpu.VMEM((tm, 1), jnp.float32),               # running per-row max
            pltpu.VMEM((tm, Fp), jnp.float32),              # f32 accumulator
        ],
        compiler_params=pltpu.CompilerParams(
            dimension_semantics=("parallel", "arbitrary")),
    )(s_src, s_dst, adj_mask, h)

    return out[:, :Fout]


def _xavier_normal(key, shape, gain=1.414):
    fan_in, fan_out = shape[0], shape[1]
    std = gain * math.sqrt(2.0 / (fan_in + fan_out))
    return std * jax.random.normal(key, shape, dtype=jnp.float32)


def _reference(x, adj_mask, W, bias, a):
    """Pure-JAX dense reference mirroring the PyTorch gat_layer (global-over-edges max)."""
    Fout = W.shape[1]
    h = x @ W + bias
    s_src = h @ a[:, :Fout].T
    s_dst = h @ a[:, Fout:].T
    e = s_src + s_dst.T
    e = jnp.where(e > 0, e, ALPHA * e)
    mask = adj_mask != 0
    e_max = jnp.max(jnp.where(mask, e, NEG_BIG))
    edge_e = jnp.where(mask, jnp.exp(e - e_max), 0.0)
    rowsum = jnp.sum(edge_e, axis=1, keepdims=True)
    h_prime = (edge_e @ h) / (rowsum + EPS)
    return jnp.where(h_prime > 0, h_prime, jnp.exp(h_prime) - 1.0)


if __name__ == "__main__":
    key = jax.random.PRNGKey(0)
    k_x, k_w, k_b, k_a, k_adj = jax.random.split(key, 5)

    N = 256            # number of graph nodes (2 row tiles x 2 col tiles of 128)
    IN_FEATURES = 16
    OUT_FEATURES = 32

    # deterministic parameters (shapes from the module's __init__)
    W = _xavier_normal(k_w, (IN_FEATURES, OUT_FEATURES))
    bias = _xavier_normal(k_b, (1, OUT_FEATURES))
    a = _xavier_normal(k_a, (1, 2 * OUT_FEATURES))

    # deterministic inputs: ~10% density adjacency + self-loops, stored as int8
    x = jax.random.normal(k_x, (N, IN_FEATURES), dtype=jnp.float32)
    adj = jax.random.uniform(k_adj, (N, N)) < 0.1
    adj = jnp.logical_or(adj, jnp.eye(N, dtype=bool)).astype(jnp.int8)

    ref = _reference(x, adj, W, bias, a)

    # f32 aggregation path: tight check (per-row max vs global max differs only via
    # the 9e-15 EPS denominator term, ~1e-14 relative).
    out_f32 = sp_graph_attention_layer(x, adj, W, bias, a, row_tile=128, col_tile=128,
                                       agg_dtype=jnp.float32)
    out_f32 = jax.block_until_ready(out_f32)
    assert out_f32.shape == (N, OUT_FEATURES)
    assert jnp.allclose(out_f32, ref, atol=1e-4, rtol=1e-4), "f32 Pallas output mismatch"

    # default bf16 MXU-operand path: tolerance reflects bf16 operand rounding (~0.4% rel).
    out_bf16 = sp_graph_attention_layer(x, adj, W, bias, a, row_tile=128, col_tile=128)
    out_bf16 = jax.block_until_ready(out_bf16)
    assert out_bf16.shape == (N, OUT_FEATURES)
    assert jnp.allclose(out_bf16, ref, atol=5e-2, rtol=5e-2), "bf16 Pallas output mismatch"

    print("KERNEL_OK")
</pallas_src>

<mosaic_0001>
module attributes {stable_mosaic.version = 11 : i64} {
  func.func @kernel(%arg0: i32, %arg1: i32, %arg2: memref<128x1xf32, #tpu.memory_space<vmem>>, %arg3: memref<1x128xf32, #tpu.memory_space<vmem>>, %arg4: memref<128x128xi8, #tpu.memory_space<vmem>>, %arg5: memref<128x128xf32, #tpu.memory_space<vmem>>, %arg6: memref<128x128xf32, #tpu.memory_space<vmem>>, %arg7: memref<128x1xf32, #tpu.memory_space<vmem>>, %arg8: memref<128x128xf32, #tpu.memory_space<vmem>>) attributes {dimension_semantics = [#tpu.dimension_semantics<parallel>, #tpu.dimension_semantics<arbitrary>], iteration_bounds = array<i64: 2, 2>, scalar_prefetch = 0 : i64, scratch_operands = 2 : i64, tpu.core_type = #tpu.core_type<tc>, window_params = [{transform_indices = @transform_0, window_bounds = array<i64: 128, 1>}, {transform_indices = @transform_1, window_bounds = array<i64: 1, 128>}, {transform_indices = @transform_2, window_bounds = array<i64: 128, 128>}, {transform_indices = @transform_3, window_bounds = array<i64: 128, 128>}, {transform_indices = @transform_4, window_bounds = array<i64: 128, 128>}]} {
    %c0_i32 = arith.constant 0 : i32
    %0 = arith.cmpi eq, %arg1, %c0_i32 : i32
    %1 = arith.extui %0 : i1 to i32
    %c0_i32_0 = arith.constant 0 : i32
    %2 = arith.cmpi ne, %1, %c0_i32_0 : i32
    scf.if %2 {
      %cst_22 = arith.constant -3.000000e+38 : f32
      %43 = vector.broadcast %cst_22 : f32 to vector<128x1xf32>
      %c0_23 = arith.constant 0 : index
      %c0_24 = arith.constant 0 : index
      %44 = vector.load %arg7[%c0_23, %c0_24] : memref<128x1xf32, #tpu.memory_space<vmem>>, vector<128x1xf32>
      tpu.vector_store %arg7[%c0_23, %c0_24], %43 {strides = array<i32>} : memref<128x1xf32, #tpu.memory_space<vmem>>, vector<128x1xf32>,
      %cst_25 = arith.constant 0.000000e+00 : f32
      %45 = vector.broadcast %cst_25 : f32 to vector<128x128xf32>
      %c0_26 = arith.constant 0 : index
      %c0_27 = arith.constant 0 : index
      %46 = vector.load %arg8[%c0_26, %c0_27] : memref<128x128xf32, #tpu.memory_space<vmem>>, vector<128x128xf32>
      tpu.vector_store %arg8[%c0_26, %c0_27], %45 {strides = array<i32>} : memref<128x128xf32, #tpu.memory_space<vmem>>, vector<128x128xf32>,
    } else {
    }
    %c0 = arith.constant 0 : index
    %c0_1 = arith.constant 0 : index
    %3 = vector.load %arg2[%c0, %c0_1] : memref<128x1xf32, #tpu.memory_space<vmem>>, vector<128x1xf32>
    %c0_2 = arith.constant 0 : index
    %c0_3 = arith.constant 0 : index
    %4 = vector.load %arg3[%c0_2, %c0_3] : memref<1x128xf32, #tpu.memory_space<vmem>>, vector<1x128xf32>
    %5 = vector.broadcast %3 : vector<128x1xf32> to vector<128x128xf32>
    %6 = vector.broadcast %4 : vector<1x128xf32> to vector<128x128xf32>
    %7 = arith.addf %5, %6 : vector<128x128xf32>
    %cst = arith.constant 0.000000e+00 : f32
    %8 = vector.broadcast %cst : f32 to vector<128x128xf32>
    %9 = arith.cmpf ogt, %7, %8 : vector<128x128xf32>
    %cst_4 = arith.constant 2.000000e-01 : f32
    %10 = vector.broadcast %cst_4 : f32 to vector<128x128xf32>
    %11 = arith.mulf %10, %7 : vector<128x128xf32>
    %12 = arith.select %9, %7, %11 : vector<128x128xi1>, vector<128x128xf32>
    %c0_5 = arith.constant 0 : index
    %c0_6 = arith.constant 0 : index
    %13 = vector.load %arg4[%c0_5, %c0_6] : memref<128x128xi8, #tpu.memory_space<vmem>>, vector<128x128xi8>
    %c0_i8 = arith.constant 0 : i8
    %14 = vector.broadcast %c0_i8 : i8 to vector<128x128xi8>
    %15 = arith.cmpi ne, %13, %14 : vector<128x128xi8>
    %c0_7 = arith.constant 0 : index
    %c0_8 = arith.constant 0 : index
    %16 = vector.load %arg7[%c0_7, %c0_8] : memref<128x1xf32, #tpu.memory_space<vmem>>, vector<128x1xf32>
    %cst_9 = arith.constant -3.000000e+38 : f32
    %17 = vector.broadcast %cst_9 : f32 to vector<128x128xf32>
    %18 = arith.select %15, %12, %17 : vector<128x128xi1>, vector<128x128xf32>
    %cst_10 = arith.constant dense<0xFF800000> : vector<128xf32>
    %19 = vector.multi_reduction <maximumf>, %18, %cst_10 [1] : vector<128x128xf32> to vector<128xf32>
    %20 = vector.shape_cast %19 : vector<128xf32> to vector<128x1xf32>
    %21 = arith.maximumf %16, %20 : vector<128x1xf32>
    %22 = arith.subf %16, %21 : vector<128x1xf32>
    %23 = math.exp %22 : vector<128x1xf32>
    %24 = arith.extui %15 : vector<128x128xi1> to vector<128x128xi32>
    %25 = arith.sitofp %24 : vector<128x128xi32> to vector<128x128xf32>
    %26 = vector.broadcast %21 : vector<128x1xf32> to vector<128x128xf32>
    %27 = arith.subf %12, %26 : vector<128x128xf32>
    %cst_11 = arith.constant 0.000000e+00 : f32
    %28 = vector.broadcast %cst_11 : f32 to vector<128x128xf32>
    %29 = arith.minimumf %27, %28 : vector<128x128xf32>
    %30 = math.exp %29 : vector<128x128xf32>
    %31 = arith.mulf %25, %30 : vector<128x128xf32>
    %c0_12 = arith.constant 0 : index
    %c0_13 = arith.constant 0 : index
    %32 = vector.load %arg8[%c0_12, %c0_13] : memref<128x128xf32, #tpu.memory_space<vmem>>, vector<128x128xf32>
    %33 = vector.broadcast %23 : vector<128x1xf32> to vector<128x128xf32>
    %34 = arith.mulf %33, %32 : vector<128x128xf32>
    %c0_14 = arith.constant 0 : index
    %c0_15 = arith.constant 0 : index
    %35 = vector.load %arg5[%c0_14, %c0_15] : memref<128x128xf32, #tpu.memory_space<vmem>>, vector<128x128xf32>
    %cst_16 = arith.constant dense<0.000000e+00> : vector<128x128xf32>
    %36 = tpu.matmul %31, %35, %cst_16 {dimension_numbers = #tpu.dot_dimension_numbers<[1], [0], [0], [1], [0, 0, 1, 1], [], []>} : vector<128x128xf32>, vector<128x128xf32>, vector<128x128xf32> -> vector<128x128xf32>
    %37 = arith.addf %34, %36 : vector<128x128xf32>
    %c0_17 = arith.constant 0 : index
    %c0_18 = arith.constant 0 : index
    %38 = vector.load %arg8[%c0_17, %c0_18] : memref<128x128xf32, #tpu.memory_space<vmem>>, vector<128x128xf32>
    tpu.vector_store %arg8[%c0_17, %c0_18], %37 {strides = array<i32>} : memref<128x128xf32, #tpu.memory_space<vmem>>, vector<128x128xf32>,
    %c0_19 = arith.constant 0 : index
    %c0_20 = arith.constant 0 : index
    %39 = vector.load %arg7[%c0_19, %c0_20] : memref<128x1xf32, #tpu.memory_space<vmem>>, vector<128x1xf32>
    tpu.vector_store %arg7[%c0_19, %c0_20], %21 {strides = array<i32>} : memref<128x1xf32, #tpu.memory_space<vmem>>, vector<128x1xf32>,
    %c1_i32 = arith.constant 1 : i32
    %40 = arith.cmpi eq, %arg1, %c1_i32 : i32
    %41 = arith.extui %40 : i1 to i32
    %c0_i32_21 = arith.constant 0 : i32
    %42 = arith.cmpi ne, %41, %c0_i32_21 : i32
    scf.if %42 {
      %c0_22 = arith.constant 0 : index
      %c0_23 = arith.constant 0 : index
      %43 = vector.load %arg8[%c0_22, %c0_23] : memref<128x128xf32, #tpu.memory_space<vmem>>, vector<128x128xf32>
      %44 = vector.extract_strided_slice %43 {offsets = [0, 32], sizes = [128, 1], strides = [1, 1]} : vector<128x128xf32> to vector<128x1xf32>
      %cst_24 = arith.constant 9.000000e-15 : f32
      %45 = vector.broadcast %cst_24 : f32 to vector<128x1xf32>
      %46 = arith.addf %44, %45 : vector<128x1xf32>
      %47 = vector.broadcast %46 : vector<128x1xf32> to vector<128x128xf32>
      %48 = arith.divf %43, %47 : vector<128x128xf32>
      %cst_25 = arith.constant 0.000000e+00 : f32
      %49 = vector.broadcast %cst_25 : f32 to vector<128x128xf32>
      %50 = arith.cmpf ogt, %48, %49 : vector<128x128xf32>
      %cst_26 = arith.constant 0.000000e+00 : f32
      %51 = vector.broadcast %cst_26 : f32 to vector<128x128xf32>
      %52 = arith.minimumf %48, %51 : vector<128x128xf32>
      %53 = math.exp %52 : vector<128x128xf32>
      %cst_27 = arith.constant 1.000000e+00 : f32
      %54 = vector.broadcast %cst_27 : f32 to vector<128x128xf32>
      %55 = arith.subf %53, %54 : vector<128x128xf32>
      %56 = arith.select %50, %48, %55 : vector<128x128xi1>, vector<128x128xf32>
      %c0_28 = arith.constant 0 : index
      %c0_29 = arith.constant 0 : index
      %57 = vector.load %arg6[%c0_28, %c0_29] : memref<128x128xf32, #tpu.memory_space<vmem>>, vector<128x128xf32>
      tpu.vector_store %arg6[%c0_28, %c0_29], %56 {strides = array<i32>} : memref<128x128xf32, #tpu.memory_space<vmem>>, vector<128x128xf32>,
    } else {
    }
    return
  }
  func.func @transform_0(%arg0: i32, %arg1: i32) -> (i32, i32) {
    %c0_i32 = arith.constant 0 : i32
    %c0_i32_0 = arith.constant 0 : i32
    return %arg0, %c0_i32 : i32, i32
  }
  func.func @transform_1(%arg0: i32, %arg1: i32) -> (i32, i32) {
    %c0_i32 = arith.constant 0 : i32
    %c0_i32_0 = arith.constant 0 : i32
    return %c0_i32, %arg1 : i32, i32
  }
  func.func @transform_2(%arg0: i32, %arg1: i32) -> (i32, i32) {
    %c0_i32 = arith.constant 0 : i32
    return %arg0, %arg1 : i32, i32
  }
  func.func @transform_3(%arg0: i32, %arg1: i32) -> (i32, i32) {
    %c0_i32 = arith.constant 0 : i32
    %c0_i32_0 = arith.constant 0 : i32
    return %arg1, %c0_i32 : i32, i32
  }
  func.func @transform_4(%arg0: i32, %arg1: i32) -> (i32, i32) {
    %c0_i32 = arith.constant 0 : i32
    %c0_i32_0 = arith.constant 0 : i32
    return %arg0, %c0_i32 : i32, i32
  }
}

</mosaic_0001>

<bundles_post_ra>
// kernel: tpu_custom_call.1
= control target key start
LH: loop header
LB: loop body
LE: loop exit
PB: predicated region body
PF: predicated region fallthrough
CT: control target
= control target key end

     0   :  { %s3119_s0 = inlined_call_operand.vmem [shape: f32[256,1], index: 0, kind: input, shape index: {}]   ;;  %s3120_s1 = inlined_call_operand.vmem [shape: f32[1,256], index: 1, kind: input, shape index: {}]   ;;  %s3121_s2 = inlined_call_operand.hbm [shape: s8[256,256], index: 2, kind: input, shape index: {}]   ;;  %s3122_s3 = inlined_call_operand.vmem [shape: f32[256,128], index: 3, kind: input, shape index: {}]   ;;  %s3123_s4 = inlined_call_operand.hbm [shape: f32[256,128], index: 4, kind: output, shape index: {}]  }
   0x1   :  { %3133 = sst [smem:[#allocation15_spill]] %s3121_s2 }
   0x2   :  { %3134 = sst [smem:[#allocation16_spill]] %s3123_s4 }
   0x3   :  { %9 = vsyncpa [#allocation5], 0 }
   0x4   :  { %11 = vsyncpa [#allocation5 + $0x1], 0 }
   0x5   :  { %12 = vsyncpa [#allocation6], 0 }
   0x6   :  { %14 = vsyncpa [#allocation6 + $0x1], 0  ;;  %s2265_s15 = smov 0   ;;  %s2267_s16 = smov 0  }
   0x7   :  { %s2269_s17 = smov 0   ;;  %s2271_s18 = smov 0  }
   0x8   :  { %s2273_s19 = smov 0   ;;  %s2275_s20 = smov 0  }
   0x9   :  { %s2277_s21 = smov 0   ;;  %s2279_s22 = smov 0  }
   0xa   :  { %s2281_s23 = smov 0   ;;  %s2283_s24 = smov 0  }
   0xb   :  { %s2285_s25 = smov 0  }
   0xc LB: > { %3135 = sst [smem:[#allocation10_spill]] %s2206_s20  ;;  %s1657_s26 = sadd.s32 4294967295, %s2226_s25   ;;  %s2226_s25 = sphi %s2285_s25, %s20_s25   ;;  %s2222_s24 = sphi %s2283_s24, %s3203_s24   ;;  %s2218_s23 = sphi %s2281_s23, %s3210_s23   ;;  %s2214_s22 = sphi %s2279_s22, %s3201_s22   ;;  %s2210_s21 = sphi %s2277_s21, %s3209_s21   ;;  %s2206_s20 = sphi %s2275_s20, %s3200_s20   ;;  %s2202_s19 = sphi %s2273_s19, %s3208_s19   ;;  %s2198_s18 = sphi %s2271_s18, %s3207_s18   ;;  %s2194_s17 = sphi %s2269_s17, %s3206_s17   ;;  %s2190_s16 = sphi %s2267_s16, %s3205_s16   ;;  %s2186_s15 = sphi %s2265_s15, %s3204_s15  }
   0xd   : > { %3136 = sst [smem:[#allocation11_spill]] %s2222_s24  ;;  %s1658_s27 = sadd.s32 4294967294, %s2226_s25  }
   0xe   : > { %s29_s28 = sadd.s32 1, %s2218_s23  ;;  %s32_s29 = sadd.s32 1, %s2222_s24 }
   0xf   : > { %p30_p0 = scmp.ge.s32.totalorder %s29_s28, 2  ;;  %s93_s30 = sadd.s32 1, %s2206_s20 }
  0x10   : > { %p100_p1 = scmp.ne.s32.totalorder %s2206_s20, %s2202_s19  ;;  %p101_p2 = scmp.eq.s32.totalorder %s2226_s25, 0 }
  0x11   : > { %s3212_s28 = smov (%p30_p0, %s29_s28), 0  ;;  %s3214_s29 = smov (!%p30_p0, %s32_s29), %s2222_s24 }
  0x12   : > { %3137 = sst [smem:[#allocation12_spill]] %s3212_s28  ;;  %s89_s5 = ssub.s32 %s2218_s23, %s3212_s28 }
  0x13   : > { %p2331_p3 = por %p101_p2, %p100_p1  ;;  %p34_p4 = scmp.ge.s32.totalorder %s3214_s29, 2 }
  0x14   : > { %p106_p5 = scmp.ne.s32.totalorder %s2202_s19, %s2198_s18  ;;  %p107_p6 = scmp.eq.s32.totalorder %s1657_s26, 0 }
  0x15   : > { %s145_s7 = sadd.s32 1, %s2194_s17  ;;  %s3216_s29 = smov (%p34_p4, %s3214_s29), 0 }
  0x16   : > { %3139 = sst [smem:[#allocation13_spill]] %s3216_s29  ;;  %p2339_p7 = por %p107_p6, %p106_p5 }
  0x17   : > { %p155_p8 = scmp.ne.s32.totalorder %s2194_s17, %s2190_s16  ;;  %s88_s9 = ssub.s32 %s2222_s24, %s3216_s29 }
  0x18   : > { %p156_p9 = scmp.eq.s32.totalorder %s1657_s26, 3  ;;  %s90_s10 = sor.u32 %s89_s5, %s88_s9 }
  0x19   : > { %p143_p10 = scmp.eq.s32.totalorder %s88_s9, 0  ;;  %p91_p11 = scmp.eq.s32.totalorder %s90_s10, 0 }
  0x1a   : > { %p2347_p12 = por %p156_p9, %p155_p8  ;;  %p161_p13 = scmp.ne.s32.totalorder %s2190_s16, %s2186_s15 }
  0x1b   : > { %s2352_s12 = scalar_select %p143_p10, %s2194_s17, %s145_s7  }
  0x1c   : > { %s2355_s13 = scalar_select %p91_p11, %s2206_s20, %s93_s30  }
  0x1d   : > { %p162_p0 = scmp.eq.s32.totalorder %s1658_s27, 3  ;;  %p1846_p1 = scmp.lt.s32.totalorder %s2226_s25, 4 }
  0x1e   : > { %3142 = sst [smem:[#allocation14_spill]] %s2355_s13  ;;  %s197_s18 = sand.u32 1, %s2206_s20  }
  0x1f   : > { %p2360_p2 = por %p162_p0, %p161_p13  ;;  %s1661_s26 = sshll.u32 %s197_s18, 5 }
  0x20   : > { %s1712_s5 = sshll.u32 %s2222_s24, 3  ;;  %s201_s10 = scalar_lea.vmem [#allocation4], %s1661_s26 }
  0x21   : > { %s207_s9 = sadd.s32 %s2218_s23, %s1712_s5  ;;  %s210_s29 = sshll.u32 %s201_s10, 4  ;;  %s211_s29 = int_to_ptr.vmem [resolvable:$true] %s210_s29 }
  0x22   : > { %s1664_s28 = sshll.u32 %s207_s9, 7  ;;  %s3144_s2 = sld [smem:[#allocation15_spill]] }
  0x23   : > { %p2372_p4 = pnand %p1846_p1, %p2331_p3  ;;  %s198_s13 = scalar_lea.sflag [#allocation5], %s197_s18 }
  0x24   : > { %s2091_s20 = scalar_lea.vmem %s211_s29, 512  ;;  %s2228_s26 = smov [#allocation4]  }
  0x25   : > { %p2080_p5 = pneg %p2372_p4  ;;  %p2092_p6 = scmp.ne.s32.totalorder %s211_s29, %s2091_s20 }
  0x26   : > { %s2096_s5 = sshll.u32 %s2228_s26, 4  ;;  %s2097_s5 = int_to_ptr.vmem [resolvable:$false] %s2096_s5 }
  0x27   : > { %p2094_p8 = pnand %p2092_p6, %p2080_p5  ;;  %s2098_s9 = scalar_lea.vmem %s2097_s5, 1024 }
  0x28   : > { %s209_s30 = scalar_lea.hbm %s3144_s2, %s1664_s28  ;;  %p2099_p10 = scmp.lt.s32.totalorder %s211_s29, %s2097_s5 }
  0x29   : > { %p2095_p9 = pneg %p2094_p8  ;;  %p2100_p11 = scmp.lt.s32.totalorder %s2098_s9, %s2091_s20 }
  0x2b   : > { %p2101_p13 = por %p2100_p11, %p2099_p10 }
  0x2d   : > { %p2102_p0 = pnand %p2101_p13, %p2095_p9 }
  0x2f   : > { %2105 = shalt.err (!%p2102_p0)
}
  0x30   : > { %s2229_s4 = smov 256   ;;  %s2230_s28 = smov 128  }
  0x31   : > { %s2231_s6 = smov 8   ;;  %p1665_p3 = scmp.ge.s32.totalorder %s2226_s25, 1 }
  0x32   : > { %1841 = dma.hbm_to_vmem [thread:$0]  (!%p2372_p4), %s209_s30, 512, %s211_s29, %s198_s13, %s2229_s4, %s2230_s28, %s2231_s6  }
  0x33   : > { %p227_p1 = scmp.lt.s32.totalorder %s2226_s25, 5 }
  0x35   : > { %p228_p5 = pnand %p1665_p3, %p227_p1 }
  0x36   : > { %s233_s18 = sand.u32 (!%p228_p5), 1, %s2202_s19  }
  0x37   : > { %231 = sbr.rel (%p228_p5) target bundleno = 963 (0x3c3), region = 36  ;;  %s1666_s10 = sshll.u32 (!%p228_p5), %s233_s18, 5 }
  0x38   : > { %s234_s20 = scalar_lea.sflag (!%p228_p5), [#allocation5], %s233_s18  ;;  %s2383_s7 = scalar_lea.vmem (!%p228_p5), [#allocation4], %s1666_s10 }
  0x3c   : > { %2177 = dma.done.wait (%p2339_p7), %s234_s20, 512  }
  0x3d   : > { %2179 = vsyncadd (%p2339_p7), %s234_s20, 4294966784  ;;  %s3128_s29 = sand.u32 1, %s2190_s16   ;;  %s1668_s13 = sshll.u32 %s2214_s22, 4 }
  0x3e   : > { %s1667_s30 = sshll.u32 %s3128_s29, 7  ;;  %p276_p4 = scmp.lt.s32.totalorder %s1668_s13, 31 }
  0x3f   : > { %p281_p6 = scmp.lt.s32.totalorder %s2210_s21, 1  ;;  %s1670_s5 = sshll.u32 %s2210_s21, 4 }
  0x40   : > { %s3218_s13 = smov (!%p276_p4, %s1668_s13), 31  ;;  %p286_p7 = scmp.lt.s32.totalorder %s1670_s5, 31 }
  0x41   : > { %s2395_s27 = scalar_select %p281_p6, %s2210_s21, 1 }
  0x42   : > { %s1669_s26 = sshll.u32 %s3218_s13, 3  ;;  %s3220_s5 = smov (!%p286_p7, %s1670_s5), 31 }
  0x43   : > { %s2401_s4 = scalar_lea.vmem %s3119_s0, %s1669_s26  ;;  %s283_s18 = scalar_lea.vmem %s3120_s1, %s2395_s27 }
  0x44   : > { %s1671_s10 = sshll.u32 %s3220_s5, 3  ;;  %s2412_s24 = scalar_lea.vmem [#allocation7], %s1667_s30 }
  0x45   : > { %s2410_s2 = scalar_lea.vmem %s3122_s3, %s1671_s10  ;;  %p1672_p8 = scmp.ne.s32.totalorder %s2210_s21, 0 }
  0x47   : > { %297 = sbr.rel (%p1672_p8) target bundleno = 93 (0x5d), region = 44 }
  0x4c   : > { %vm298_vm0 = vcmask 7168   ;;  %v2232_v0 = vmov -3e+38   ;;  %v2233_v1 = vmov 0.0  }
  0x4d   : > { %299 = vst.msk [vmem:[#allocation2] sm:$0xff] %vm298_vm0, %v2232_v0  ;;  %300 = vst.msk [vmem:[#allocation2 + $0x8] sm:$0xff] %vm298_vm0, %v2232_v0 }
  0x4e   : > { %301 = vst.msk [vmem:[#allocation2 + $0x10] sm:$0xff] %vm298_vm0, %v2232_v0  ;;  %302 = vst.msk [vmem:[#allocation2 + $0x18] sm:$0xff] %vm298_vm0, %v2232_v0 }
  0x4f   : > { %303 = vst.msk [vmem:[#allocation2 + $0x20] sm:$0xff] %vm298_vm0, %v2232_v0  ;;  %304 = vst.msk [vmem:[#allocation2 + $0x28] sm:$0xff] %vm298_vm0, %v2232_v0 }
  0x50   : > { %305 = vst.msk [vmem:[#allocation2 + $0x30] sm:$0xff] %vm298_vm0, %v2232_v0  ;;  %306 = vst.msk [vmem:[#allocation2 + $0x38] sm:$0xff] %vm298_vm0, %v2232_v0 }
  0x51   : > { %307 = vst.msk [vmem:[#allocation2 + $0x40] sm:$0xff] %vm298_vm0, %v2232_v0  ;;  %308 = vst.msk [vmem:[#allocation2 + $0x48] sm:$0xff] %vm298_vm0, %v2232_v0 }
  0x52   : > { %309 = vst.msk [vmem:[#allocation2 + $0x50] sm:$0xff] %vm298_vm0, %v2232_v0  ;;  %310 = vst.msk [vmem:[#allocation2 + $0x58] sm:$0xff] %vm298_vm0, %v2232_v0 }
  0x53   : > { %311 = vst.msk [vmem:[#allocation2 + $0x60] sm:$0xff] %vm298_vm0, %v2232_v0  ;;  %312 = vst.msk [vmem:[#allocation2 + $0x68] sm:$0xff] %vm298_vm0, %v2232_v0 }
  0x54   : > { %313 = vst.msk [vmem:[#allocation2 + $0x70] sm:$0xff] %vm298_vm0, %v2232_v0  ;;  %314 = vst.msk [vmem:[#allocation2 + $0x78] sm:$0xff] %vm298_vm0, %v2232_v0 }
  0x55   : > { %315 = vst [vmem:[#allocation3 + $0x30] sm:$0xff] %v2233_v1  ;;  %316 = vst [vmem:[#allocation3] sm:$0xff] %v2233_v1 }
  0x56   : > { %317 = vst [vmem:[#allocation3 + $0x58] sm:$0xff] %v2233_v1  ;;  %318 = vst [vmem:[#allocation3 + $0x18] sm:$0xff] %v2233_v1 }
  0x57   : > { %319 = vst [vmem:[#allocation3 + $0x50] sm:$0xff] %v2233_v1  ;;  %320 = vst [vmem:[#allocation3 + $0x68] sm:$0xff] %v2233_v1 }
  0x58   : > { %321 = vst [vmem:[#allocation3 + $0x8] sm:$0xff] %v2233_v1  ;;  %322 = vst [vmem:[#allocation3 + $0x48] sm:$0xff] %v2233_v1 }
  0x59   : > { %323 = vst [vmem:[#allocation3 + $0x40] sm:$0xff] %v2233_v1  ;;  %324 = vst [vmem:[#allocation3 + $0x20] sm:$0xff] %v2233_v1 }
  0x5a   : > { %325 = vst [vmem:[#allocation3 + $0x10] sm:$0xff] %v2233_v1  ;;  %326 = vst [vmem:[#allocation3 + $0x38] sm:$0xff] %v2233_v1 }
  0x5b   : > { %327 = vst [vmem:[#allocation3 + $0x60] sm:$0xff] %v2233_v1  ;;  %328 = vst [vmem:[#allocation3 + $0x70] sm:$0xff] %v2233_v1 }
  0x5c   : > { %329 = vst [vmem:[#allocation3 + $0x78] sm:$0xff] %v2233_v1  ;;  %330 = vst [vmem:[#allocation3 + $0x28] sm:$0xff] %v2233_v1 }
  0x5d PF: > { %v332_v2 = vld [vmem:[%s2401_s4 + $0x8] sm:$0xff]  ;;  %v331_v3 = vld [vmem:[%s2401_s4] sm:$0xff]  ;;  %v2234_v4 = vmov 0   ;;  %v341_v7 = vld [vmem:[%s2401_s4 + $0x50] sm:$0xff]  ;;  %p1690_p9 = scmp.ne.s32.totalorder %s2210_s21, 1 }
  0x5e   : > { %1947 = vset.pattern.permute.xlu1 %v2234_v4  ;;  %1946 = vset.pattern.permute.xlu0 %v2234_v4  ;;  %v340_v5 = vld [vmem:[%s2401_s4 + $0x48] sm:$0xff]  ;;  %v339_v6 = vld [vmem:[%s2401_s4 + $0x40] sm:$0xff]  ;;  %v333_v8 = vld [vmem:[%s2401_s4 + $0x10] sm:$0xff] }
  0x5f   : > { %355 = vperm.xlu1 %1947, %v332_v2   ;;  %350 = vperm.xlu0 %1946, %v331_v3   ;;  %v342_v9 = vld [vmem:[%s2401_s4 + $0x58] sm:$0xff]  ;;  %v343_v11 = vld [vmem:[%s2401_s4 + $0x60] sm:$0xff]  ;;  %v344_v13 = vld [vmem:[%s2401_s4 + $0x68] sm:$0xff] }
  0x60   : > { %v334_v10 = vld [vmem:[%s2401_s4 + $0x18] sm:$0xff]  ;;  %v335_v12 = vld [vmem:[%s2401_s4 + $0x20] sm:$0xff]  ;;  %v336_v14 = vld [vmem:[%s2401_s4 + $0x28] sm:$0xff] }
  0x61   : > { %v345_v15 = vld [vmem:[%s2401_s4 + $0x70] sm:$0xff]  ;;  %v346_v17 = vld [vmem:[%s2401_s4 + $0x78] sm:$0xff]  ;;  %v498_v19 = vld [vmem:[%s2383_s7] sm:$0xff] }
  0x62   : > { %v337_v16 = vld [vmem:[%s2401_s4 + $0x30] sm:$0xff]  ;;  %v338_v18 = vld [vmem:[%s2401_s4 + $0x38] sm:$0xff]  ;;  %vm502_vm1 = vnez %v498_v19  ;;  %v499_v34 = vld [vmem:[%s2383_s7 + $0x8] sm:$0xff] }
  0x63   : > { %395 = vperm.xlu1 %1947, %v340_v5   ;;  %390 = vperm.xlu0 %1946, %v339_v6   ;;  %v500_v20 = vld [vmem:[%s2383_s7 + $0x10] sm:$0xff]  ;;  %v522_v21 = vsel %vm502_vm1, 16843009, %v2234_v4  ;;  %v501_v37 = vld [vmem:[%s2383_s7 + $0x18] sm:$0xff]  ;;  %vm503_vm3 = vnez %v499_v34  ;;  %v2476_v2 = vld [vmem:[%s283_s18] ss:$0 sm:$0xff] }
  0x64   : > { %vm504_vm2 = vnez %v500_v20  ;;  %v526_v23 = vunpack.c.0.s8 %v522_v21  ;;  %v527_v24 = vunpack.c.1.s8 %v522_v21  ;;  %v528_v30 = vunpack.c.2.s8 %v522_v21 }
  0x65   : > { %v524_v22 = vsel %vm504_vm2, 16843009, %v2234_v4  ;;  %v529_v32 = vunpack.c.3.s8 %v522_v21  ;;  %vm505_vm4 = vnez %v501_v37  ;;  %v2456_v46 = vsel %vm503_vm3, 16843009, %v2234_v4 }
  0x66   : > { %v534_v25 = vunpack.c.0.s8 %v524_v22  ;;  %v542_v26 = vpack.c.b16 %v526_v23, %v526_v23  ;;  %v535_v27 = vunpack.c.1.s8 %v524_v22  ;;  %v544_v28 = vpack.c.b16 %v527_v24, %v527_v24 }
  0x67   : > { %400 = vperm.xlu1 %1947, %v341_v7   ;;  %360 = vperm.xlu0 %1946, %v333_v8   ;;  %v536_v31 = vunpack.c.2.s8 %v524_v22  ;;  %v537_v33 = vunpack.c.3.s8 %v524_v22  ;;  %v546_v40 = vpack.c.b16 %v528_v30, %v528_v30  ;;  %v548_v42 = vpack.c.b16 %v529_v32, %v529_v32 }
  0x68   : > { %v558_v29 = vpack.c.b16 %v534_v25, %v534_v25  ;;  %v543_v35 = vpack.c.b8 %v542_v26, %v542_v26  ;;  %v560_v36 = vpack.c.b16 %v535_v27, %v535_v27  ;;  %v545_v38 = vpack.c.b8 %v544_v28, %v544_v28 }
  0x69   : > { %v562_v41 = vpack.c.b16 %v536_v31, %v536_v31  ;;  %v564_v43 = vpack.c.b16 %v537_v33, %v537_v33  ;;  %v547_v45 = vpack.c.b8 %v546_v40, %v546_v40  ;;  %v2459_v48 = vsel %vm505_vm4, 16843009, %v2234_v4 }
  0x6a   : > { %v559_v39 = vpack.c.b8 %v558_v29, %v558_v29  ;;  %vm574_vm5 = vnez %v543_v35  ;;  %v561_v44 = vpack.c.b8 %v560_v36, %v560_v36  ;;  %vm575_vm6 = vnez %v545_v38 }
  0x6b   : > { %405 = vperm.xlu1 %1947, %v342_v9   ;;  %365 = vperm.xlu0 %1946, %v334_v10   ;;  %v563_v47 = vpack.c.b8 %v562_v41, %v562_v41  ;;  %v590_v49 = vsel %vm574_vm5, 16843009, %v2234_v4  ;;  %v549_v50 = vpack.c.b8 %v548_v42, %v548_v42  ;;  %v565_v51 = vpack.c.b8 %v564_v43, %v564_v43 }
  0x6c   : > { %vm582_vm7 = vnez %v559_v39  ;;  %v591_v52 = vsel %vm575_vm6, 16843009, %v2234_v4  ;;  %vm583_vm8 = vnez %v561_v44  ;;  %v530_v54 = vunpack.c.0.s8 %v2456_v46 }
  0x6d   : > { %v598_v53 = vsel %vm582_vm7, 16843009, %v2234_v4  ;;  %vm576_vm9 = vnez %v547_v45  ;;  %v538_v55 = vunpack.c.0.s8 %v2459_v48  ;;  %v606_v56 = vunpack.c.0.s8 %v590_v49 }
  0x6e   : > { %vm584_vm10 = vnez %v563_v47  ;;  %v531_v57 = vunpack.c.1.s8 %v2456_v46  ;;  %v607_v58 = vunpack.c.0.s8 %v591_v52  ;;  %v614_v59 = vunpack.c.0.s8 %v598_v53 }
  0x6f   : > { %410 = vperm.xlu1 %1947, %v343_v11   ;;  %370 = vperm.xlu0 %1946, %v335_v12   ;;  %v599_v60 = vsel %vm583_vm8, 16843009, %v2234_v4  ;;  %vm577_vm11 = vnez %v549_v50  ;;  %v592_v61 = vsel %vm576_vm9, 16843009, %v2234_v4  ;;  %vm585_vm12 = vnez %v565_v51 }
  0x70   : > { %v550_v62 = vpack.c.b16 %v530_v54, %v530_v54  ;;  %v539_v63 = vunpack.c.1.s8 %v2459_v48  ;;  %v600_v0 = vsel %vm584_vm10, 16843009, %v2234_v4  ;;  %v566_v1 = vpack.c.b16 %v538_v55, %v538_v55 }
  0x71   : > { %vm2478_vm13 = vcmp.ne.s32.totalorder %v606_v56, 0  ;;  %v615_v5 = vunpack.c.0.s8 %v599_v60  ;;  %v593_v6 = vsel %vm577_vm11, 16843009, %v2234_v4  ;;  %v552_v7 = vpack.c.b16 %v531_v57, %v531_v57 }
  0x72   : > { %vm2483_vm14 = vcmp.ne.s32.totalorder %v607_v58, 0  ;;  %vm2487_vm15 = vcmp.ne.s32.totalorder %v614_v59, 0  ;;  %v608_v10 = vunpack.c.0.s8 %v592_v61  ;;  %v2492_v11 = vsel %vm585_vm12, 16843009, %v2234_v4 }
  0x73   : > { %415 = vperm.xlu1 %1947, %v344_v13   ;;  %375 = vperm.xlu0 %1946, %v336_v14   ;;  %v532_v12 = vunpack.c.2.s8 %v2456_v46  ;;  %v609_v21 = vunpack.c.0.s8 %v593_v6  ;;  %v567_v22 = vpack.c.b8 %v566_v1, %v566_v1  ;;  %v617_v23 = vunpack.c.0.s8 %v2492_v11 }
  0x74   : > { %v553_v24 = vpack.c.b8 %v552_v7, %v552_v7  ;;  %v533_v25 = vunpack.c.3.s8 %v2456_v46  ;;  %v541_v26 = vunpack.c.3.s8 %v2459_v48  ;;  %vm2501_vm1 = vcmp.ne.s32.totalorder %v615_v5, 0 }
  0x75   : > { %vm2505_vm2 = vcmp.ne.s32.totalorder %v608_v10, 0  ;;  %v554_v31 = vpack.c.b16 %v532_v12, %v532_v12  ;;  %vm2517_vm5 = vnez %v567_v22  ;;  %vm2536_vm9 = vcmp.ne.s32.totalorder %v609_v21, 0 }
  0x76   : > { %vm2524_vm6 = vnez %v553_v24  ;;  %v556_v43 = vpack.c.b16 %v533_v25, %v533_v25  ;;  %v2528_v44 = vpack.c.b16 %v541_v26, %v541_v26  ;;  %v602_v53 = vsel %vm2517_vm5, 16843009, %v2234_v4 }
  0x77   : > { %420 = vperm.xlu1 %1947, %v345_v15   ;;  %380 = vperm.xlu0 %1946, %v337_v16   ;;  %v616_v15 = vunpack.c.0.s8 %v600_v0  ;;  %v551_v16 = vpack.c.b8 %v550_v62, %v550_v62  ;;  %v555_v54 = vpack.c.b8 %v554_v31, %v554_v31  ;;  %v595_v61 = vsel %vm2524_vm6, 16843009, %v2234_v4 }
  0x78   : > { %v618_v11 = vunpack.c.0.s8 %v602_v53  ;;  %v3172_v26 = vmov 0 }
  0x79   : > { %vm2509_vm4 = vnez %v551_v16  ;;  %vm2532_vm8 = vcmp.ne.s32.totalorder %v616_v15, 0  ;;  %v611_v16 = vunpack.c.0.s8 %v595_v61 }
  0x7a   : > { %v594_v52 = vsel %vm2509_vm4, 16843009, %v2234_v4  ;;  %vm2583_vm4 = vnez %v555_v54 }
  0x7b   : > { %425 = vperm.xlu1 %1947, %v346_v17   ;;  %385 = vperm.xlu0 %1946, %v338_v18   ;;  %v568_v17 = vpack.c.b16 %v539_v63, %v539_v63  ;;  %v540_v18 = vunpack.c.2.s8 %v2459_v48  ;;  %v610_v10 = vunpack.c.0.s8 %v594_v52  ;;  %v596_v34 = vsel %vm2583_vm4, 16843009, %v2234_v4 }
  0x7c   : > { %vm2620_vm4 = vcmp.ne.s32.totalorder %v618_v11, 0  ;;  %v612_v54 = vunpack.c.0.s8 %v596_v34 }
  0x7d   : > { %v569_v35 = vpack.c.b8 %v568_v17, %v568_v17  ;;  %v570_v36 = vpack.c.b16 %v540_v18, %v540_v18 }
  0x7f   : > { %vm2550_vm11 = vnez %v569_v35  ;;  %v571_v62 = vpack.c.b8 %v570_v36, %v570_v36 }
  0x80   : > { %v603_v12 = vsel %vm2550_vm11, 16843009, %v2234_v4 }
  0xda   : > { %v356_v13 = vpop.permute.xlu1 %355  ;;  %v351_v14 = vpop.permute.xlu0 %350 }
  0xdb   : > { %v435_v19 = vadd.f32 %v2476_v2, %v356_v13  ;;  %v434_v20 = vadd.f32 %v2476_v2, %v351_v14 }
  0xdd   : > { %v467_v27 = vmul.f32 0.2, %v435_v19  ;;  %v466_v28 = vmul.f32 0.2, %v434_v20  ;;  %vm450_vm0 = vcmp.gt.f32.partialorder %v434_v20, 0.0  ;;  %vm451_vm3 = vcmp.gt.f32.partialorder %v435_v19, 0.0 }
  0xde   : > { %v396_v32 = vpop.permute.xlu1 %395  ;;  %v391_v33 = vpop.permute.xlu0 %390 }
  0xdf   : > { %v443_v37 = vadd.f32 %v2476_v2, %v396_v32  ;;  %v442_v38 = vadd.f32 %v2476_v2, %v391_v33  ;;  %v2515_v39 = vsel %vm450_vm0, %v434_v20, %v466_v28  ;;  %v2530_v47 = vsel %vm451_vm3, %v435_v19, %v467_v27 }
  0xe0   : > { %v638_v41 = vsel %vm2478_vm13, %v2515_v39, -3e+38  ;;  %v639_v59 = vsel %vm2483_vm14, %v2530_v47, -3e+38  ;;  %vm2566_vm0 = vcmp.ne.s32.totalorder %v617_v23, 0  ;;  %v557_v20 = vpack.c.b8 %v556_v43, %v556_v43 }
  0xe1   : > { %v475_v45 = vmul.f32 0.2, %v443_v37  ;;  %v474_v46 = vmul.f32 0.2, %v442_v38  ;;  %654 = vmax.xlane.f32.xlu0 %v638_v41  ;;  %vm458_vm7 = vcmp.gt.f32.partialorder %v442_v38, 0.0  ;;  %vm459_vm10 = vcmp.gt.f32.partialorder %v443_v37, 0.0 }
  0xe2   : > { %v401_v50 = vpop.permute.xlu1 %400  ;;  %v361_v51 = vpop.permute.xlu0 %360  ;;  %v619_v27 = vunpack.c.0.s8 %v603_v12  ;;  %vm2611_vm11 = vnez %v557_v20 }
  0xe3   : > { %v444_v55 = vadd.f32 %v2476_v2, %v401_v50  ;;  %v436_v56 = vadd.f32 %v2476_v2, %v361_v51  ;;  %v2548_v57 = vsel %vm458_vm7, %v442_v38, %v474_v46  ;;  %v2564_v1 = vsel %vm459_vm10, %v443_v37, %v475_v45 }
  0xe4   : > { %v646_v60 = vsel %vm2487_vm15, %v2548_v57, -3e+38  ;;  %v647_v17 = vsel %vm2501_vm1, %v2564_v1, -3e+38  ;;  %vm2590_vm7 = vcmp.ne.s32.totalorder %v610_v10, 0  ;;  %vm2594_vm10 = vnez %v571_v62 }
  0xe5   : > { %v476_v63 = vmul.f32 0.2, %v444_v55  ;;  %v468_v0 = vmul.f32 0.2, %v436_v56  ;;  %656 = vmax.xlane.f32.xlu0 %v639_v59  ;;  %670 = vmax.xlane.f32.xlu1 %v646_v60  ;;  %vm452_vm12 = vcmp.gt.f32.partialorder %v436_v56, 0.0  ;;  %vm460_vm3 = vcmp.gt.f32.partialorder %v444_v55, 0.0 }
  0xe6   : > { %v406_v6 = vpop.permute.xlu1 %405  ;;  %v366_v7 = vpop.permute.xlu0 %365  ;;  %v3173_v26 = vsel %vm2590_vm7, 4294967295, %v3172_v26  ;;  %v573_v38 = vpack.c.b8 %v2528_v44, %v2528_v44  ;;  %v3180_v50 = vmov 0  ;;  %v604_v44 = vsel %vm2594_vm10, 16843009, %v2234_v4 }
  0xe7   : > { %v445_v13 = vadd.f32 %v2476_v2, %v406_v6  ;;  %v437_v14 = vadd.f32 %v2476_v2, %v366_v7  ;;  %v2575_v15 = vsel %vm452_vm12, %v436_v56, %v468_v0  ;;  %v2588_v23 = vsel %vm460_vm3, %v444_v55, %v476_v63 }
  0xe8   : > { %v640_v18 = vsel %vm2505_vm2, %v2575_v15, -3e+38  ;;  %v648_v35 = vsel %vm2532_vm8, %v2588_v23, -3e+38  ;;  %v597_v58 = vsel %vm2611_vm11, 16843009, %v2234_v4  ;;  %v620_v7 = vunpack.c.0.s8 %v604_v44 }
  0xe9   : > { %v477_v21 = vmul.f32 0.2, %v445_v13  ;;  %v469_v22 = vmul.f32 0.2, %v437_v14  ;;  %672 = vmax.xlane.f32.xlu0 %v647_v17  ;;  %658 = vmax.xlane.f32.xlu1 %v640_v18  ;;  %vm453_vm5 = vcmp.gt.f32.partialorder %v437_v14, 0.0  ;;  %vm461_vm6 = vcmp.gt.f32.partialorder %v445_v13, 0.0 }
  0xea   : > { %v411_v24 = vpop.permute.xlu1 %410  ;;  %v371_v25 = vpop.permute.xlu0 %370  ;;  %vm2659_vm11 = vcmp.ne.s32.totalorder %v612_v54, 0  ;;  %v613_v17 = vunpack.c.0.s8 %v597_v58  ;;  %v1067_v54 = vld [vmem:[%s2410_s2 + $0x68] sm:$0xff] }
  0xeb   : > { %v446_v31 = vadd.f32 %v2476_v2, %v411_v24  ;;  %v438_v32 = vadd.f32 %v2476_v2, %v371_v25  ;;  %v2600_v33 = vsel %vm453_vm5, %v437_v14, %v469_v22  ;;  %v2618_v42 = vsel %vm461_vm6, %v445_v13, %v477_v21 }
  0xec   : > { %v641_v36 = vsel %vm2536_vm9, %v2600_v33, -3e+38  ;;  %vm2624_vm5 = vcmp.ne.s32.totalorder %v611_v16, 0  ;;  %v649_v55 = vsel %vm2566_vm0, %v2618_v42, -3e+38  ;;  %vm2644_vm6 = vnez %v573_v38 }
  0xed   : > { %v478_v40 = vmul.f32 0.2, %v446_v31  ;;  %v470_v41 = vmul.f32 0.2, %v438_v32  ;;  %674 = vmax.xlane.f32.xlu0 %v648_v35  ;;  %660 = vmax.xlane.f32.xlu1 %v641_v36  ;;  %vm454_vm12 = vcmp.gt.f32.partialorder %v438_v32, 0.0  ;;  %vm462_vm3 = vcmp.gt.f32.partialorder %v446_v31, 0.0 }
  0xee   : > { %v416_v43 = vpop.permute.xlu1 %415  ;;  %v376_v45 = vpop.permute.xlu0 %375  ;;  %v3181_v50 = vsel %vm2624_vm5, 4294967295, %v3180_v50  ;;  %v3186_v13 = vmov 0  ;;  %v605_v18 = vsel %vm2644_vm6, 16843009, %v2234_v4  ;;  %vm2688_vm6 = vcmp.ne.s32.totalorder %v613_v17, 0  ;;  %v2736_v17 = vld [vmem:[#allocation2 + $0x10] sm:$0xff] }
  0xef   : > { %v447_v51 = vadd.f32 %v2476_v2, %v416_v43  ;;  %v439_v52 = vadd.f32 %v2476_v2, %v376_v45  ;;  %v2633_v53 = vsel %vm454_vm12, %v438_v32, %v470_v41  ;;  %v2649_v62 = vsel %vm462_vm3, %v446_v31, %v478_v40 }
  0xf0   : > { %v642_v56 = vsel %vm2590_vm7, %v2633_v53, -3e+38  ;;  %vm2651_vm7 = vcmp.ne.s32.totalorder %v619_v27, 0  ;;  %v3187_v13 = vsel %vm2659_vm11, 4294967295, %v3186_v13  ;;  %v650_v14 = vsel %vm2620_vm4, %v2649_v62, -3e+38 }
  0xf1   : > { %v479_v60 = vmul.f32 0.2, %v447_v51  ;;  %v471_v61 = vmul.f32 0.2, %v439_v52  ;;  %676 = vmax.xlane.f32.xlu0 %v649_v55  ;;  %662 = vmax.xlane.f32.xlu1 %v642_v56  ;;  %vm455_vm10 = vcmp.gt.f32.partialorder %v439_v52, 0.0  ;;  %vm463_vm12 = vcmp.gt.f32.partialorder %v447_v51, 0.0 }
  0xf2   : > { %v421_v63 = vpop.permute.xlu1 %420  ;;  %v381_v0 = vpop.permute.xlu0 %380  ;;  %v621_v35 = vunpack.c.0.s8 %v605_v18  ;;  %v2714_v55 = vld [vmem:[#allocation2] sm:$0xff]  ;;  %v2738_v18 = vld [vmem:[#allocation2 + $0x48] sm:$0xff] }
  0xf3   : > { %v448_v10 = vadd.f32 %v2476_v2, %v421_v63  ;;  %v440_v11 = vadd.f32 %v2476_v2, %v381_v0  ;;  %v2657_v12 = vsel %vm455_vm10, %v439_v52, %v471_v61  ;;  %v2672_v21 = vsel %vm463_vm12, %v447_v51, %v479_v60  ;;  %v1069_v51 = vld [vmem:[%s2410_s2 + $0x78] sm:$0xff]  ;;  %v1068_v52 = vld [vmem:[%s2410_s2 + $0x70] sm:$0xff]  ;;  %v1066_v56 = vld [vmem:[%s2410_s2 + $0x60] sm:$0xff] }
  0xf4   : > { %v643_v16 = vsel %vm2624_vm5, %v2657_v12, -3e+38  ;;  %vm2678_vm5 = vcmp.ne.s32.totalorder %v620_v7, 0  ;;  %v651_v4 = vsel %vm2651_vm7, %v2672_v21, -3e+38  ;;  %1746 = vmatprep.subr.mxu0 %v1069_v51  ;;  %1802 = vmatprep.subr.mxu1 %v1069_v51  ;;  %v1065_v60 = vld [vmem:[%s2410_s2 + $0x58] sm:$0xff] }
  0xf5   : > { %v480_v19 = vmul.f32 0.2, %v448_v10  ;;  %v472_v20 = vmul.f32 0.2, %v440_v11  ;;  %678 = vmax.xlane.f32.xlu0 %v650_v14  ;;  %664 = vmax.xlane.f32.xlu1 %v643_v16  ;;  %vm456_vm3 = vcmp.gt.f32.partialorder %v440_v11, 0.0  ;;  %vm464_vm10 = vcmp.gt.f32.partialorder %v448_v10, 0.0 }
  0xf6   : > { %v426_v22 = vpop.permute.xlu1 %425  ;;  %v386_v24 = vpop.permute.xlu0 %385  ;;  %1747 = vmatpush3.msra.mxu0 %v1069_v51  ;;  %1818 = vmatpush3.msra.mxu1 %v1069_v51  ;;  %v2721_v61 = vld [vmem:[#allocation2 + $0x40] sm:$0xff]  ;;  %v2723_v63 = vld [vmem:[#allocation2 + $0x8] sm:$0xff]  ;;  %v1064_v0 = vld [vmem:[%s2410_s2 + $0x50] sm:$0xff] }
  0xf7   : > { %v449_v25 = vadd.f32 %v2476_v2, %v426_v22  ;;  %v441_v27 = vadd.f32 %v2476_v2, %v386_v24  ;;  %v2676_v28 = vsel %vm456_vm3, %v440_v11, %v472_v20  ;;  %v2692_v37 = vsel %vm464_vm10, %v448_v10, %v480_v19  ;;  %1748 = vmatprep.subr.mxu0 %v1068_v52  ;;  %v1063_v16 = vld [vmem:[%s2410_s2 + $0x48] sm:$0xff]  ;;  %v1062_v19 = vld [vmem:[%s2410_s2 + $0x40] sm:$0xff] }
  0xf8   : > { %v644_v32 = vsel %vm2659_vm11, %v2676_v28, -3e+38  ;;  %v652_v40 = vsel %vm2678_vm5, %v2692_v37, -3e+38  ;;  %vm2704_vm11 = vcmp.ne.s32.totalorder %v621_v35, 0  ;;  %1803 = vmatprep.subr.mxu1 %v1068_v52  ;;  %1749 = vmatpush3.msra.mxu0 %v1068_v52  ;;  %vm1247_vm10 = vcmask 7168  }
  0xf9   : > { %v481_v2 = vmul.f32 0.2, %v449_v25  ;;  %v473_v36 = vmul.f32 0.2, %v441_v27  ;;  %680 = vmax.xlane.f32.xlu0 %v651_v4  ;;  %666 = vmax.xlane.f32.xlu1 %v644_v32  ;;  %vm457_vm12 = vcmp.gt.f32.partialorder %v441_v27, 0.0  ;;  %vm465_vm3 = vcmp.gt.f32.partialorder %v449_v25, 0.0 }
  0xfa   : > { %1819 = vmatpush3.msra.mxu1 %v1068_v52  ;;  %1750 = vmatprep.subr.mxu0 %v1067_v54  ;;  %v2752_v4 = vld [vmem:[#allocation2 + $0x18] sm:$0xff]  ;;  %v2754_v32 = vld [vmem:[#allocation2 + $0x50] sm:$0xff]  ;;  %v510_v51 = vld [vmem:[#allocation2 + $0x20] sm:$0xff] }
  0xfb   : > { %v2694_v38 = vsel %vm457_vm12, %v441_v27, %v473_v36  ;;  %v2702_v43 = vsel %vm465_vm3, %v449_v25, %v481_v2  ;;  %1804 = vmatprep.subr.mxu1 %v1067_v54  ;;  %1751 = vmatpush3.msra.mxu0 %v1067_v54  ;;  %v1061_v27 = vld [vmem:[%s2410_s2 + $0x38] sm:$0xff]  ;;  %v1060_v35 = vld [vmem:[%s2410_s2 + $0x30] sm:$0xff] }
  0xfc   : > { %v645_v41 = vsel %vm2688_vm6, %v2694_v38, -3e+38  ;;  %v653_v44 = vsel %vm2704_vm11, %v2702_v43, -3e+38  ;;  %1820 = vmatpush3.msra.mxu1 %v1067_v54  ;;  %1752 = vmatprep.subr.mxu0 %v1066_v56  ;;  %v2767_v52 = vld [vmem:[#allocation2 + $0x58] sm:$0xff]  ;;  %v1059_v54 = vld [vmem:[%s2410_s2 + $0x28] sm:$0xff] }
  0xfd   : > { %682 = vmax.xlane.f32.xlu0 %v652_v40  ;;  %668 = vmax.xlane.f32.xlu1 %v645_v41 }
  0xfe   : > { %1805 = vmatprep.subr.mxu1 %v1066_v56  ;;  %1753 = vmatpush3.msra.mxu0 %v1066_v56 }
  0xff   : > { %1821 = vmatpush3.msra.mxu1 %v1066_v56  ;;  %1754 = vmatprep.subr.mxu0 %v1065_v60 }
 0x100   : > { %1806 = vmatprep.subr.mxu1 %v1065_v60  ;;  %1755 = vmatpush3.msra.mxu0 %v1065_v60 }
 0x101   : > { %684 = vmax.xlane.f32.xlu0 %v653_v44  ;;  %1756 = vmatprep.subr.mxu0 %v1064_v0 }
 0x102   : > { %1822 = vmatpush3.msra.mxu1 %v1065_v60  ;;  %1757 = vmatpush3.msra.mxu0 %v1064_v0 }
 0x103   : > { %1807 = vmatprep.subr.mxu1 %v1064_v0  ;;  %1758 = vmatprep.subr.mxu0 %v1063_v16 }
 0x104   : > { %1823 = vmatpush3.msra.mxu1 %v1064_v0  ;;  %1759 = vmatpush3.msra.mxu0 %v1063_v16 }
 0x105   : > { %1808 = vmatprep.subr.mxu1 %v1063_v16  ;;  %1760 = vmatprep.subr.mxu0 %v1062_v19 }
 0x106   : > { %1824 = vmatpush3.msra.mxu1 %v1063_v16  ;;  %1761 = vmatpush3.msra.mxu0 %v1062_v19  ;;  %v511_v16 = vld [vmem:[#allocation2 + $0x28] sm:$0xff] }
 0x107   : > { %1809 = vmatprep.subr.mxu1 %v1062_v19  ;;  %1762 = vmatprep.subr.mxu0 %v1061_v27 }
 0x108   : > { %1825 = vmatpush3.msra.mxu1 %v1062_v19  ;;  %1763 = vmatpush3.msra.mxu0 %v1061_v27  ;;  %v2781_v19 = vld [vmem:[#allocation2 + $0x60] sm:$0xff] }
 0x109   : > { %1810 = vmatprep.subr.mxu1 %v1061_v27  ;;  %1764 = vmatprep.subr.mxu0 %v1060_v35 }
 0x10a   : > { %1826 = vmatpush3.msra.mxu1 %v1061_v27  ;;  %1765 = vmatpush3.msra.mxu0 %v1060_v35 }
 0x10b   : > { %1811 = vmatprep.subr.mxu1 %v1060_v35  ;;  %1766 = vmatprep.subr.mxu0 %v1059_v54 }
 0x10c   : > { %1827 = vmatpush3.msra.mxu1 %v1060_v35  ;;  %1767 = vmatpush3.msra.mxu0 %v1059_v54 }
 0x10d   : > { %1812 = vmatprep.subr.mxu1 %v1059_v54 }
 0x10e   : > { %1828 = vmatpush3.msra.mxu1 %v1059_v54 }
 0x16a   : > { %v655_v58 = vpop.xlane.xlu0 %654 }
 0x16b   : > { %v2718_v59 = vmax.f32 %v2714_v55, %v655_v58 }
 0x16d   : > { %1248 = vst.msk [vmem:[#allocation2] sm:$0xff] %vm1247_vm10, %v2718_v59  ;;  %784 = vperm.xlu1 %1947, %v2718_v59   ;;  %v702_v2 = vsub.f32 %v2714_v55, %v2718_v59 }
 0x16e   : > { %v671_v7 = vpop.xlane.xlu1 %670  ;;  %v657_v10 = vpop.xlane.xlu0 %656 }
 0x16f   : > { %v2730_v11 = vmax.f32 %v2721_v61, %v671_v7  ;;  %v2733_v14 = vmax.f32 %v2723_v63, %v657_v10  ;;  %v718_v55 = vmul.f32 1.442695, %v702_v2  ;;  %v1058_v10 = vld [vmem:[%s2410_s2 + $0x20] sm:$0xff] }
 0x170   : > { %1768 = vmatprep.subr.mxu0 %v1058_v10  ;;  %1813 = vmatprep.subr.mxu1 %v1058_v10 }
 0x171   : > { %1256 = vst.msk [vmem:[#allocation2 + $0x40] sm:$0xff] %vm1247_vm10, %v2730_v11  ;;  %1249 = vst.msk [vmem:[#allocation2 + $0x8] sm:$0xff] %vm1247_vm10, %v2733_v14  ;;  %824 = vperm.xlu0 %1946, %v2730_v11   ;;  %789 = vperm.xlu1 %1947, %v2733_v14   ;;  %v703_v56 = vsub.f32 %v2723_v63, %v2733_v14  ;;  %v1057_v63 = vld [vmem:[%s2410_s2 + $0x18] sm:$0xff]  ;;  %1948 = vpow2.f32 %v718_v55  ;;  %v1056_v55 = vld [vmem:[%s2410_s2 + $0x10] sm:$0xff] }
 0x172   : > { %v659_v20 = vpop.xlane.xlu1 %658  ;;  %v673_v22 = vpop.xlane.xlu0 %672  ;;  %1769 = vmatpush3.msra.mxu0 %v1058_v10  ;;  %1829 = vmatpush3.msra.mxu1 %v1058_v10  ;;  %v2803_v10 = vld [vmem:[#allocation2 + $0x70] sm:$0xff] }
 0x173   : > { %v688_v24 = vmax.f32 %v2736_v17, %v659_v20  ;;  %v2749_v25 = vmax.f32 %v2738_v18, %v673_v22  ;;  %v720_v14 = vmul.f32 1.442695, %v703_v56  ;;  %1770 = vmatprep.subr.mxu0 %v1057_v63  ;;  %1814 = vmatprep.subr.mxu1 %v1057_v63 }
 0x174   : > { %1771 = vmatpush3.msra.mxu0 %v1057_v63  ;;  %1830 = vmatpush3.msra.mxu1 %v1057_v63 }
 0x175   : > { %1250 = vst.msk [vmem:[#allocation2 + $0x10] sm:$0xff] %vm1247_vm10, %v688_v24  ;;  %1257 = vst.msk [vmem:[#allocation2 + $0x48] sm:$0xff] %vm1247_vm10, %v2749_v25  ;;  %794 = vperm.xlu0 %1946, %v688_v24   ;;  %829 = vperm.xlu1 %1947, %v2749_v25   ;;  %v704_v60 = vsub.f32 %v2736_v17, %v688_v24  ;;  %1950 = vpow2.f32 %v720_v14  ;;  %v1054_v14 = vld [vmem:[%s2410_s2] sm:$0xff] }
 0x176   : > { %v661_v36 = vpop.xlane.xlu1 %660  ;;  %v675_v40 = vpop.xlane.xlu0 %674  ;;  %1772 = vmatprep.subr.mxu0 %v1056_v55  ;;  %1815 = vmatprep.subr.mxu1 %v1056_v55 }
 0x177   : > { %v689_v41 = vmax.f32 %v2752_v4, %v661_v36  ;;  %v2765_v44 = vmax.f32 %v2754_v32, %v675_v40  ;;  %v722_v24 = vmul.f32 1.442695, %v704_v60  ;;  %v512_v36 = vld [vmem:[#allocation2 + $0x30] sm:$0xff]  ;;  %v2792_v40 = vld [vmem:[#allocation2 + $0x68] sm:$0xff]  ;;  %1773 = vmatpush3.msra.mxu0 %v1056_v55  ;;  %1831 = vmatpush3.msra.mxu1 %v1056_v55 }
 0x178   : > { %v1055_v60 = vld [vmem:[%s2410_s2 + $0x8] sm:$0xff] }
 0x179   : > { %1251 = vst.msk [vmem:[#allocation2 + $0x18] sm:$0xff] %vm1247_vm10, %v689_v41  ;;  %1258 = vst.msk [vmem:[#allocation2 + $0x50] sm:$0xff] %vm1247_vm10, %v2765_v44  ;;  %799 = vperm.xlu0 %1946, %v689_v41   ;;  %834 = vperm.xlu1 %1947, %v2765_v44   ;;  %v705_v17 = vsub.f32 %v2752_v4, %v689_v41  ;;  %1952 = vpow2.f32 %v722_v24 }
 0x17a   : > { %v663_v58 = vpop.xlane.xlu1 %662  ;;  %v677_v59 = vpop.xlane.xlu0 %676  ;;  %1774 = vmatprep.subr.mxu0 %v1055_v60  ;;  %1816 = vmatprep.subr.mxu1 %v1055_v60 }
 0x17b   : > { %v690_v0 = vmax.f32 %v510_v51, %v663_v58  ;;  %v2778_v7 = vmax.f32 %v2767_v52, %v677_v59  ;;  %v724_v4 = vmul.f32 1.442695, %v705_v17  ;;  %v710_v17 = vsub.f32 %v2721_v61, %v2730_v11  ;;  %1775 = vmatpush3.msra.mxu0 %v1055_v60  ;;  %1832 = vmatpush3.msra.mxu1 %v1055_v60 }
 0x17c   : > { %1776 = vmatprep.subr.mxu0 %v1054_v14  ;;  %v711_v11 = vsub.f32 %v2738_v18, %v2749_v25  ;;  %1817 = vmatprep.subr.mxu1 %v1054_v14 }
 0x17d   : > { %1252 = vst.msk [vmem:[#allocation2 + $0x20] sm:$0xff] %vm1247_vm10, %v690_v0  ;;  %1259 = vst.msk [vmem:[#allocation2 + $0x58] sm:$0xff] %vm1247_vm10, %v2778_v7  ;;  %804 = vperm.xlu0 %1946, %v690_v0   ;;  %839 = vperm.xlu1 %1947, %v2778_v7   ;;  %v706_v27 = vsub.f32 %v510_v51, %v690_v0  ;;  %v513_v0 = vld [vmem:[#allocation2 + $0x38] sm:$0xff]  ;;  %1954 = vpow2.f32 %v724_v4  ;;  %v734_v61 = vmul.f32 1.442695, %v710_v17 }
 0x17e   : > { %v665_v20 = vpop.xlane.xlu1 %664  ;;  %v679_v22 = vpop.xlane.xlu0 %678  ;;  %1777 = vmatpush3.msra.mxu0 %v1054_v14  ;;  %1833 = vmatpush3.msra.mxu1 %v1054_v14  ;;  %v713_v18 = vsub.f32 %v2767_v52, %v2778_v7 }
 0x17f   : > { %v691_v35 = vmax.f32 %v511_v16, %v665_v20  ;;  %v2790_v2 = vmax.f32 %v2781_v19, %v679_v22  ;;  %v726_v56 = vmul.f32 1.442695, %v706_v27  ;;  %v1949_v4 = vpop.eup %1948 }
 0x181   : > { %1253 = vst.msk [vmem:[#allocation2 + $0x28] sm:$0xff] %vm1247_vm10, %v691_v35  ;;  %1260 = vst.msk [vmem:[#allocation2 + $0x60] sm:$0xff] %vm1247_vm10, %v2790_v2  ;;  %809 = vperm.xlu0 %1946, %v691_v35   ;;  %844 = vperm.xlu1 %1947, %v2790_v2   ;;  %v707_v41 = vsub.f32 %v511_v16, %v691_v35  ;;  %1956 = vpow2.f32 %v726_v56 }
 0x182   : > { %v667_v51 = vpop.xlane.xlu1 %666  ;;  %v681_v54 = vpop.xlane.xlu0 %680 }
 0x183   : > { %v692_v58 = vmax.f32 %v512_v36, %v667_v51  ;;  %v2800_v59 = vmax.f32 %v2792_v40, %v681_v54  ;;  %v728_v63 = vmul.f32 1.442695, %v707_v41  ;;  %v712_v41 = vsub.f32 %v2754_v32, %v2765_v44  ;;  %v1951_v25 = vpop.eup %1950 }
 0x184   : > { %v740_v44 = vmul.f32 1.442695, %v713_v18 }
 0x185   : > { %v708_v16 = vsub.f32 %v512_v36, %v692_v58  ;;  %1254 = vst.msk [vmem:[#allocation2 + $0x30] sm:$0xff] %vm1247_vm10, %v692_v58  ;;  %1261 = vst.msk [vmem:[#allocation2 + $0x68] sm:$0xff] %vm1247_vm10, %v2800_v59  ;;  %814 = vperm.xlu0 %1946, %v692_v58   ;;  %849 = vperm.xlu1 %1947, %v2800_v59   ;;  %v521_v36 = vld [vmem:[#allocation2 + $0x78] sm:$0xff]  ;;  %1958 = vpow2.f32 %v728_v63  ;;  %v736_v58 = vmul.f32 1.442695, %v711_v11 }
 0x186   : > { %v669_v20 = vpop.xlane.xlu1 %668  ;;  %v683_v22 = vpop.xlane.xlu0 %682  ;;  %v738_v60 = vmul.f32 1.442695, %v712_v41 }
 0x187   : > { %v730_v24 = vmul.f32 1.442695, %v708_v16  ;;  %v693_v27 = vmax.f32 %v513_v0, %v669_v20  ;;  %v700_v35 = vmax.f32 %v2803_v10, %v683_v22  ;;  %v1953_v32 = vpop.eup %1952  ;;  %v715_v16 = vsub.f32 %v2792_v40, %v2800_v59 }
 0x189   : > { %v709_v51 = vsub.f32 %v513_v0, %v693_v27  ;;  %1255 = vst.msk [vmem:[#allocation2 + $0x38] sm:$0xff] %vm1247_vm10, %v693_v27  ;;  %1262 = vst.msk [vmem:[#allocation2 + $0x70] sm:$0xff] %vm1247_vm10, %v700_v35  ;;  %819 = vperm.xlu0 %1946, %v693_v27   ;;  %854 = vperm.xlu1 %1947, %v700_v35   ;;  %1960 = vpow2.f32 %v730_v24  ;;  %v714_v0 = vsub.f32 %v2781_v19, %v2790_v2 }
 0x18a   : > { %v685_v55 = vpop.xlane.xlu0 %684  ;;  %1962 = vpow2.f32 %v734_v61  ;;  %v1955_v14 = vpop.eup %1954  ;;  %v716_v63 = vsub.f32 %v2803_v10, %v700_v35  ;;  %v744_v7 = vmul.f32 1.442695, %v715_v16 }
 0x18b   : > { %v732_v54 = vmul.f32 1.442695, %v709_v51  ;;  %v701_v56 = vmax.f32 %v521_v36, %v685_v55  ;;  %v742_v17 = vmul.f32 1.442695, %v714_v0 }
 0x18c   : > { %v746_v2 = vmul.f32 1.442695, %v716_v63 }
 0x18d   : > { %1263 = vst.msk [vmem:[#allocation2 + $0x78] sm:$0xff] %vm1247_vm10, %v701_v56  ;;  %960 = vperm.xlu0 %1946, %v1949_v4   ;;  %859 = vperm.xlu1 %1947, %v701_v56   ;;  %1964 = vpow2.f32 %v732_v54  ;;  %v717_v20 = vsub.f32 %v521_v36, %v701_v56 }
 0x18e   : > { %1966 = vpow2.f32 %v736_v58  ;;  %v1957_v52 = vpop.eup %1956 }
 0x18f   : > { %1968 = vpow2.f32 %v738_v60  ;;  %v748_v40 = vmul.f32 1.442695, %v717_v20 }
 0x190   : > { %1970 = vpow2.f32 %v740_v44 }
 0x191   : > { %970 = vperm.xlu0 %1946, %v1953_v32   ;;  %965 = vperm.xlu1 %1947, %v1951_v25   ;;  %1972 = vpow2.f32 %v742_v17 }
 0x192   : > { %v1959_v19 = vpop.eup %1958  ;;  %1974 = vpow2.f32 %v744_v7 }
 0x193   : > { %1976 = vpow2.f32 %v746_v2 }
 0x194   : > { %1978 = vpow2.f32 %v748_v40 }
 0x195   : > { %980 = vperm.xlu0 %1946, %v1957_v52   ;;  %975 = vperm.xlu1 %1947, %v1955_v14  }
 0x196   : > { %v1961_v22 = vpop.eup %1960 }
 0x197   : > { %v1963_v24 = vpop.eup %1962 }
 0x199   : > { %990 = vperm.xlu0 %1946, %v1961_v22   ;;  %985 = vperm.xlu1 %1947, %v1959_v19  }
 0x19a   : > { %v1965_v59 = vpop.eup %1964 }
 0x19b   : > { %v1967_v10 = vpop.eup %1966 }
 0x19c   : > { %v1969_v27 = vpop.eup %1968 }
 0x19d   : > { %1000 = vperm.xlu0 %1946, %v1963_v24   ;;  %995 = vperm.xlu1 %1947, %v1965_v59   ;;  %v1971_v35 = vpop.eup %1970 }
 0x19e   : > { %v1973_v51 = vpop.eup %1972 }
 0x19f   : > { %v1975_v36 = vpop.eup %1974 }
 0x1a0   : > { %v1977_v61 = vpop.eup %1976 }
 0x1a1   : > { %1010 = vperm.xlu0 %1946, %v1969_v27   ;;  %1005 = vperm.xlu1 %1947, %v1967_v10   ;;  %v1979_v11 = vpop.eup %1978 }
 0x1a5   : > { %1020 = vperm.xlu0 %1946, %v1973_v51   ;;  %1015 = vperm.xlu1 %1947, %v1971_v35  }
 0x1a9   : > { %1030 = vperm.xlu0 %1946, %v1977_v61   ;;  %1025 = vperm.xlu1 %1947, %v1975_v36   ;;  %v2235_v36 = vmov 0.0  }
 0x1aa   : > { %v1682_v3 = vsel %vm2487_vm15, 1.0, %v2235_v36  ;;  %v1676_v9 = vsel %vm2505_vm2, 1.0, %v2235_v36  ;;  %v1684_v30 = vsel %vm2532_vm8, 1.0, %v2235_v36  ;;  %v1686_v5 = vsel %vm2620_vm4, 1.0, %v2235_v36 }
 0x1ab   : > { %vm3196_vm15 = vnez %v3187_v13  ;;  %v1681_v6 = vsel %vm2688_vm6, 1.0, %v2235_v36 }
 0x1ac   : > { %v1680_v46 = vsel %vm3196_vm15, 1.0, %v2235_v36 }
 0x1ad   : > { %1035 = vperm.xlu1 %1947, %v1979_v11  }
 0x1e8   : > { %v785_v55 = vpop.permute.xlu1 %784 }
 0x1e9   : > { %v862_v4 = vsub.f32 %v2515_v39, %v785_v55 }
 0x1eb   : > { %v878_v41 = vmin.f32 %v862_v4, 0.0 }
 0x1ec   : > { %v790_v54 = vpop.permute.xlu1 %789  ;;  %v825_v56 = vpop.permute.xlu0 %824 }
 0x1ed   : > { %v894_v58 = vmul.f32 1.442695, %v878_v41  ;;  %v863_v18 = vsub.f32 %v2530_v47, %v790_v54  ;;  %v870_v25 = vsub.f32 %v2548_v57, %v825_v56 }
 0x1ef   : > { %1980 = vpow2.f32 %v894_v58  ;;  %v879_v60 = vmin.f32 %v863_v18, 0.0  ;;  %v886_v0 = vmin.f32 %v870_v25, 0.0 }
 0x1f0   : > { %v830_v32 = vpop.permute.xlu1 %829  ;;  %v795_v44 = vpop.permute.xlu0 %794 }
 0x1f1   : > { %v896_v16 = vmul.f32 1.442695, %v879_v60  ;;  %v910_v14 = vmul.f32 1.442695, %v886_v0  ;;  %v871_v17 = vsub.f32 %v2564_v1, %v830_v32  ;;  %v864_v63 = vsub.f32 %v2575_v15, %v795_v44 }
 0x1f2   : > { %v1683_v44 = vsel %vm2501_vm1, 1.0, %v2235_v36 }
 0x1f3   : > { %1982 = vpow2.f32 %v896_v16  ;;  %v887_v39 = vmin.f32 %v871_v17, 0.0  ;;  %v880_v52 = vmin.f32 %v864_v63, 0.0 }
 0x1f4   : > { %1984 = vpow2.f32 %v910_v14  ;;  %v835_v7 = vpop.permute.xlu1 %834  ;;  %v800_v19 = vpop.permute.xlu0 %799 }
 0x1f5   : > { %v912_v47 = vmul.f32 1.442695, %v887_v39  ;;  %v898_v2 = vmul.f32 1.442695, %v880_v52  ;;  %v872_v57 = vsub.f32 %v2588_v23, %v835_v7  ;;  %v865_v20 = vsub.f32 %v2600_v33, %v800_v19 }
 0x1f6   : > { %v1674_v23 = vsel %vm2478_vm13, 1.0, %v2235_v36  ;;  %vm3194_vm13 = vnez %v3173_v26 }
 0x1f7   : > { %1986 = vpow2.f32 %v912_v47  ;;  %v888_v22 = vmin.f32 %v872_v57, 0.0  ;;  %v881_v24 = vmin.f32 %v865_v20, 0.0  ;;  %v1677_v20 = vsel %vm2536_vm9, 1.0, %v2235_v36 }
 0x1f8   : > { %1988 = vpow2.f32 %v898_v2  ;;  %v840_v40 = vpop.permute.xlu1 %839  ;;  %v805_v1 = vpop.permute.xlu0 %804 }
 0x1f9   : > { %v914_v59 = vmul.f32 1.442695, %v888_v22  ;;  %v900_v15 = vmul.f32 1.442695, %v881_v24  ;;  %v873_v10 = vsub.f32 %v2618_v42, %v840_v40  ;;  %v866_v27 = vsub.f32 %v2633_v53, %v805_v1 }
 0x1fa   : > { %v1675_v53 = vsel %vm2483_vm14, 1.0, %v2235_v36  ;;  %vm3195_vm14 = vnez %v3181_v50 }
 0x1fb   : > { %1990 = vpow2.f32 %v914_v59  ;;  %v889_v35 = vmin.f32 %v873_v10, 0.0  ;;  %v882_v51 = vmin.f32 %v866_v27, 0.0  ;;  %v1678_v27 = vsel %vm3194_vm13, 1.0, %v2235_v36 }
 0x1fc   : > { %v1981_v33 = vpop.eup %1980  ;;  %1992 = vpow2.f32 %v900_v15  ;;  %v845_v61 = vpop.permute.xlu1 %844  ;;  %v1685_v15 = vsel %vm2566_vm0, 1.0, %v2235_v36 }
 0x1fd   : > { %v810_v11 = vpop.permute.xlu0 %809  ;;  %v916_v55 = vmul.f32 1.442695, %v889_v35  ;;  %v902_v4 = vmul.f32 1.442695, %v882_v51  ;;  %v874_v41 = vsub.f32 %v2649_v62, %v845_v61  ;;  %v926_v54 = vmul.f32 %v1981_v33, %v1674_v23 }
 0x1fe   : > { %v867_v42 = vsub.f32 %v2657_v12, %v810_v11  ;;  %v1679_v11 = vsel %vm3195_vm14, 1.0, %v2235_v36 }
 0x1ff   : > { %1994 = vpow2.f32 %v916_v55  ;;  %v890_v56 = vmin.f32 %v874_v41, 0.0  ;;  %1778 = vmatprep.mubr.f32.mxu0 %v926_v54  ;;  %v1687_v41 = vsel %vm2651_vm7, 1.0, %v2235_v36 }
 0x200   : > { %v883_v58 = vmin.f32 %v867_v42, 0.0  ;;  %v1983_v18 = vpop.eup %1982  ;;  %1996 = vpow2.f32 %v902_v4  ;;  %v850_v25 = vpop.permute.xlu1 %849 }
 0x201   : > { %v815_v60 = vpop.permute.xlu0 %814  ;;  %v1985_v62 = vpop.eup %1984  ;;  %v918_v0 = vmul.f32 1.442695, %v890_v56  ;;  %v875_v32 = vsub.f32 %v2672_v21, %v850_v25  ;;  %v927_v16 = vmul.f32 %v1983_v18, %v1675_v53  ;;  %v1688_v56 = vsel %vm2678_vm5, 1.0, %v2235_v36 }
 0x202   : > { %v904_v12 = vmul.f32 1.442695, %v883_v58  ;;  %v868_v8 = vsub.f32 %v2676_v28, %v815_v60  ;;  %v934_v14 = vmul.f32 %v1985_v62, %v1682_v3  ;;  %v1689_v25 = vsel %vm2704_vm11, 1.0, %v2235_v36  ;;  %v951_v36 = vld [vmem:[#allocation3 + $0x20] sm:$0xff] }
 0x203   : > { %1998 = vpow2.f32 %v918_v0  ;;  %v891_v17 = vmin.f32 %v875_v32, 0.0  ;;  %1779 = vmatmul.mubr.f32.vlgmr.msra.gmra.mxu0 %v927_v16 }
 0x204   : > { %v884_v63 = vmin.f32 %v868_v8, 0.0  ;;  %v1987_v39 = vpop.eup %1986  ;;  %2000 = vpow2.f32 %v904_v12  ;;  %1790 = vmatprep.mubr.f32.mxu1 %v934_v14  ;;  %v855_v21 = vpop.permute.xlu1 %854  ;;  %v943_v14 = vld [vmem:[#allocation3] sm:$0xff] }
 0x205   : > { %v820_v52 = vpop.permute.xlu0 %819  ;;  %v1989_v28 = vpop.eup %1988  ;;  %v920_v7 = vmul.f32 1.442695, %v891_v17  ;;  %v876_v29 = vsub.f32 %v2692_v37, %v855_v21  ;;  %v935_v57 = vmul.f32 %v1987_v39, %v1683_v44  ;;  %v942_v17 = vld [vmem:[#allocation3 + $0x30] sm:$0xff] }
 0x206   : > { %v906_v19 = vmul.f32 1.442695, %v884_v63  ;;  %v869_v47 = vsub.f32 %v2694_v38, %v820_v52  ;;  %v928_v2 = vmul.f32 %v1989_v28, %v1676_v9  ;;  %v950_v28 = vld [vmem:[#allocation3 + $0x40] sm:$0xff] }
 0x207   : > { %2002 = vpow2.f32 %v920_v7  ;;  %v892_v22 = vmin.f32 %v876_v29, 0.0  ;;  %1791 = vmatmul.mubr.f32.vlgmr.msra.gmra.mxu1 %v935_v57 }
 0x208   : > { %v885_v24 = vmin.f32 %v869_v47, 0.0  ;;  %v1991_v40 = vpop.eup %1990  ;;  %2004 = vpow2.f32 %v906_v19  ;;  %1781 = vmatprep.mubr.f32.mxu0 %v928_v2  ;;  %v860_v37 = vpop.permute.xlu1 %859 }
 0x209   : > { %v1993_v1 = vpop.eup %1992  ;;  %v922_v38 = vmul.f32 1.442695, %v892_v22  ;;  %v877_v48 = vsub.f32 %v2702_v43, %v860_v37  ;;  %v936_v49 = vmul.f32 %v1991_v40, %v1684_v30  ;;  %v961_v12 = vpop.permute.xlu0 %960  ;;  %v945_v30 = vld [vmem:[#allocation3 + $0x18] sm:$0xff] }
 0x20a   : > { %v908_v59 = vmul.f32 1.442695, %v885_v24  ;;  %v929_v10 = vmul.f32 %v1993_v1, %v1677_v20  ;;  %v1038_v21 = vmul.f32 %v961_v12, %v942_v17  ;;  %v944_v22 = vld [vmem:[#allocation3 + $0x58] sm:$0xff]  ;;  %v957_v12 = vld [vmem:[#allocation3 + $0x28] sm:$0xff] }
 0x20b   : > { %2006 = vpow2.f32 %v922_v38  ;;  %v893_v35 = vmin.f32 %v877_v48, 0.0  ;;  %1793 = vmatprep.mubr.f32.mxu1 %v936_v49  ;;  %v953_v37 = vld [vmem:[#allocation3 + $0x38] sm:$0xff] }
 0x20c   : > { %v1995_v51 = vpop.eup %1994  ;;  %2008 = vpow2.f32 %v908_v59  ;;  %1782 = vmatmul.mubr.f32.gmra.mxu0 %v929_v10  ;;  %v966_v0 = vpop.permute.xlu1 %965 }
 0x20d   : > { %v1997_v23 = vpop.eup %1996  ;;  %v924_v33 = vmul.f32 1.442695, %v893_v35  ;;  %v937_v61 = vmul.f32 %v1995_v51, %v1685_v15  ;;  %v971_v34 = vpop.permute.xlu0 %970  ;;  %v1039_v45 = vmul.f32 %v966_v0, %v943_v14  ;;  %v952_v15 = vld [vmem:[#allocation3 + $0x10] sm:$0xff] }
 0x20e   : > { %v930_v43 = vmul.f32 %v1997_v23, %v1678_v27  ;;  %v1040_v48 = vmul.f32 %v971_v34, %v944_v22 }
 0x20f   : > { %2010 = vpow2.f32 %v924_v33  ;;  %1794 = vmatmul.mubr.f32.gmra.mxu1 %v937_v61  ;;  %v947_v33 = vld [vmem:[#allocation3 + $0x68] sm:$0xff] }
 0x210   : > { %v1999_v26 = vpop.eup %1998  ;;  %1784 = vmatprep.mubr.f32.mxu0 %v930_v43  ;;  %v976_v32 = vpop.permute.xlu1 %975 }
 0x211   : > { %v2001_v55 = vpop.eup %2000  ;;  %v938_v4 = vmul.f32 %v1999_v26, %v1686_v5  ;;  %v981_v44 = vpop.permute.xlu0 %980  ;;  %v1041_v40 = vmul.f32 %v976_v32, %v945_v30 }
 0x212   : > { %v931_v42 = vmul.f32 %v2001_v55, %v1679_v11  ;;  %v946_v11 = vld [vmem:[#allocation3 + $0x50] sm:$0xff] }
 0x213   : > { %1796 = vmatprep.mubr.f32.mxu1 %v938_v4  ;;  %v955_v4 = vld [vmem:[#allocation3 + $0x70] sm:$0xff] }
 0x214   : > { %v2003_v53 = vpop.eup %2002  ;;  %1785 = vmatmul.mubr.f32.gmra.mxu0 %v931_v42  ;;  %v986_v8 = vpop.permute.xlu1 %985 }
 0x215   : > { %v2005_v50 = vpop.eup %2004  ;;  %v939_v54 = vmul.f32 %v2003_v53, %v1687_v41  ;;  %v2893_v9 = vpop.permute.xlu0 %990  ;;  %v1043_v55 = vmul.f32 %v986_v8, %v947_v33  ;;  %v954_v53 = vld [vmem:[#allocation3 + $0x60] sm:$0xff] }
 0x216   : > { %v932_v58 = vmul.f32 %v2005_v50, %v1680_v46  ;;  %v1042_v46 = vmul.f32 %v981_v44, %v946_v11  ;;  %v956_v44 = vld [vmem:[#allocation3 + $0x78] sm:$0xff] }
 0x217   : > { %1797 = vmatmul.mubr.f32.gmra.mxu1 %v939_v54 }
 0x218   : > { %v2007_v3 = vpop.eup %2006  ;;  %1787 = vmatprep.mubr.f32.mxu0 %v932_v58  ;;  %v2891_v16 = vpop.permute.xlu1 %995 }
 0x219   : > { %v2009_v18 = vpop.eup %2008  ;;  %v940_v13 = vmul.f32 %v2007_v3, %v1688_v56  ;;  %v1001_v7 = vpop.permute.xlu0 %1000 }
 0x21a   : > { %v933_v60 = vmul.f32 %v2009_v18, %v1681_v6  ;;  %v1046_v57 = vmul.f32 %v1001_v7, %v950_v28  ;;  %v949_v18 = vld [vmem:[#allocation3 + $0x48] sm:$0xff] }
 0x21b   : > { %1799 = vmatprep.mubr.f32.mxu1 %v940_v13  ;;  %v1045_v0 = vmul.f32 %v2891_v16, %v949_v18 }
 0x21c   : > { %v2011_v62 = vpop.eup %2010  ;;  %1788 = vmatmul.mubr.f32.gmra.mxu0 %v933_v60  ;;  %v1006_v63 = vpop.permute.xlu1 %1005 }
 0x21d   : > { %v941_v31 = vmul.f32 %v2011_v62, %v1689_v25  ;;  %v1047_v29 = vmul.f32 %v1006_v63, %v951_v36  ;;  %v1011_v10 = vpop.permute.xlu0 %1010  ;;  %v948_v62 = vld [vmem:[#allocation3 + $0x8] sm:$0xff] }
 0x21e   : > { %v1048_v61 = vmul.f32 %v1011_v10, %v952_v15  ;;  %v1044_v8 = vmul.f32 %v2893_v9, %v948_v62 }
 0x21f   : > { %1800 = vmatmul.mubr.f32.gmra.mxu1 %v941_v31 }
 0x220   : > { %v1016_v1 = vpop.permute.xlu1 %1015 }
 0x221   : > { %v1049_v27 = vmul.f32 %v1016_v1, %v953_v37  ;;  %v1021_v50 = vpop.permute.xlu0 %1020 }
 0x222   : > { %v1050_v13 = vmul.f32 %v1021_v50, %v954_v53 }
 0x224   : > { %v1026_v41 = vpop.permute.xlu1 %1025 }
 0x225   : > { %v1051_v56 = vmul.f32 %v1026_v41, %v955_v4  ;;  %v1031_v14 = vpop.permute.xlu0 %1030 }
 0x228   : > { %v1036_v32 = vpop.permute.xlu1 %1035 }
 0x2c3   : > { %v1780_v39 = vpop.f32.mrf.mxu0 }
 0x2c4   : > { %v1216_v52 = vadd.f32 %v1780_v39, %v1039_v45  ;;  %v1053_v45 = vmul.f32 %v1036_v32, %v957_v12 }
 0x2c5   : > { %v1136_v19 = vpop.f32.mrf.mxu0 }
 0x2c6   : > { %1232 = vst [vmem:[#allocation3] sm:$0xff] %v1216_v52  ;;  %v1215_v47 = vadd.f32 %v1136_v19, %v1038_v21  ;;  %v1052_v21 = vmul.f32 %v1031_v14, %v956_v44 }
 0x2c7   : > { %v1792_v2 = vpop.f32.mrf.mxu1 }
 0x2c8   : > { %1231 = vst [vmem:[#allocation3 + $0x30] sm:$0xff] %v1215_v47  ;;  %v1224_v20 = vadd.f32 %v1792_v2, %v1047_v29 }
 0x2c9   : > { %v1176_v24 = vpop.f32.mrf.mxu1 }
 0x2ca   : > { %1240 = vst [vmem:[#allocation3 + $0x20] sm:$0xff] %v1224_v20  ;;  %v1223_v38 = vadd.f32 %v1176_v24, %v1046_v57 }
 0x2cc   : > { %v1783_v59 = vpop.f32.mrf.mxu0  ;;  %1239 = vst [vmem:[#allocation3 + $0x40] sm:$0xff] %v1223_v38 }
 0x2cd   : > { %v1218_v49 = vadd.f32 %v1783_v59, %v1041_v40 }
 0x2ce   : > { %v1146_v35 = vpop.f32.mrf.mxu0 }
 0x2cf   : > { %1234 = vst [vmem:[#allocation3 + $0x18] sm:$0xff] %v1218_v49  ;;  %v1217_v51 = vadd.f32 %v1146_v35, %v1040_v48  ;;  %v1795_v23 = vpop.f32.mrf.mxu1 }
 0x2d0   : > { %v1226_v5 = vadd.f32 %v1795_v23, %v1049_v27 }
 0x2d1   : > { %1233 = vst [vmem:[#allocation3 + $0x58] sm:$0xff] %v1217_v51  ;;  %v1186_v43 = vpop.f32.mrf.mxu1 }
 0x2d2   : > { %1242 = vst [vmem:[#allocation3 + $0x38] sm:$0xff] %v1226_v5  ;;  %v1225_v26 = vadd.f32 %v1186_v43, %v1048_v61 }
 0x2d4   : > { %1241 = vst [vmem:[#allocation3 + $0x10] sm:$0xff] %v1225_v26  ;;  %v1786_v42 = vpop.f32.mrf.mxu0 }
 0x2d5   : > { %v1220_v54 = vadd.f32 %v1786_v42, %v1043_v55 }
 0x2d6   : > { %v1156_v58 = vpop.f32.mrf.mxu0 }
 0x2d7   : > { %1236 = vst [vmem:[#allocation3 + $0x68] sm:$0xff] %v1220_v54  ;;  %v1219_v6 = vadd.f32 %v1156_v58, %v1042_v46  ;;  %v1798_v3 = vpop.f32.mrf.mxu1 }
 0x2d8   : > { %v1228_v25 = vadd.f32 %v1798_v3, %v1051_v56 }
 0x2d9   : > { %1235 = vst [vmem:[#allocation3 + $0x50] sm:$0xff] %v1219_v6  ;;  %v1196_v60 = vpop.f32.mrf.mxu1 }
 0x2da   : > { %1244 = vst [vmem:[#allocation3 + $0x70] sm:$0xff] %v1228_v25  ;;  %v1227_v31 = vadd.f32 %v1196_v60, %v1050_v13 }
 0x2dc   : > { %1243 = vst [vmem:[#allocation3 + $0x60] sm:$0xff] %v1227_v31  ;;  %v1789_v34 = vpop.f32.mrf.mxu0 }
 0x2dd   : > { %v1222_v17 = vadd.f32 %v1789_v34, %v1045_v0 }
 0x2de   : > { %v1166_v36 = vpop.f32.mrf.mxu0 }
 0x2df   : > { %1238 = vst [vmem:[#allocation3 + $0x48] sm:$0xff] %v1222_v17  ;;  %v1221_v63 = vadd.f32 %v1166_v36, %v1044_v8  ;;  %v1801_v39 = vpop.f32.mrf.mxu1 }
 0x2e0   : > { %v1230_v52 = vadd.f32 %v1801_v39, %v1053_v45  ;;  %1267 = sbr.rel (%p1690_p9) target bundleno = 937 (0x3a9), region = 48 }
 0x2e1   : > { %1237 = vst [vmem:[#allocation3 + $0x8] sm:$0xff] %v1221_v63  ;;  %v1206_v28 = vpop.f32.mrf.mxu1 }
 0x2e2   : > { %1246 = vst [vmem:[#allocation3 + $0x28] sm:$0xff] %v1230_v52  ;;  %v1229_v16 = vadd.f32 %v1206_v28, %v1052_v21 }
 0x2e4   : > { %1245 = vst [vmem:[#allocation3 + $0x78] sm:$0xff] %v1229_v16 }
 0x2e5   : > { %v2898_v7 = vld [vmem:[#allocation3 + $0x58] sm:$0xff]  ;;  %v2900_v9 = vld [vmem:[#allocation3 + $0x30] sm:$0xff]  ;;  %v2236_v29 = vmov 32   ;;  %v2906_v2 = vld [vmem:[#allocation3] sm:$0xff] }
 0x2e6   : > { %v2902_v19 = vld [vmem:[#allocation3 + $0x18] sm:$0xff]  ;;  %2013 = vset.pattern.permute.xlu1 %v2236_v29  ;;  %2012 = vset.pattern.permute.xlu0 %v2236_v29  ;;  %v1286_v47 = vadd.f32 9e-15, %v2898_v7  ;;  %v1284_v30 = vadd.f32 9e-15, %v2900_v9  ;;  %v2910_v22 = vld [vmem:[#allocation3 + $0x68] sm:$0xff] }
 0x2e7   : > { %v1287_v57 = vadd.f32 9e-15, %v2902_v19  ;;  %v1285_v20 = vadd.f32 9e-15, %v2906_v2  ;;  %v2912_v24 = vld [vmem:[#allocation3 + $0x50] sm:$0xff]  ;;  %v2916_v1 = vld [vmem:[#allocation3 + $0x48] sm:$0xff] }
 0x2e8   : > { %1312 = vperm.xlu1 %2013, %v1286_v47   ;;  %1302 = vperm.xlu0 %2012, %v1284_v30   ;;  %v1289_v40 = vadd.f32 9e-15, %v2910_v22  ;;  %v1288_v37 = vadd.f32 9e-15, %v2912_v24  ;;  %v2918_v38 = vld [vmem:[#allocation3 + $0x8] sm:$0xff]  ;;  %v2922_v15 = vld [vmem:[#allocation3 + $0x20] sm:$0xff] }
 0x2e9   : > { %v1291_v59 = vadd.f32 9e-15, %v2916_v1  ;;  %v1290_v48 = vadd.f32 9e-15, %v2918_v38  ;;  %v2924_v10 = vld [vmem:[#allocation3 + $0x40] sm:$0xff]  ;;  %v2928_v35 = vld [vmem:[#allocation3 + $0x38] sm:$0xff] }
 0x2ea   : > { %v1293_v49 = vadd.f32 9e-15, %v2922_v15  ;;  %v1292_v27 = vadd.f32 9e-15, %v2924_v10  ;;  %v2930_v51 = vld [vmem:[#allocation3 + $0x10] sm:$0xff]  ;;  %v2936_v5 = vld [vmem:[#allocation3 + $0x60] sm:$0xff] }
 0x2eb   : > { %v1295_v23 = vadd.f32 9e-15, %v2928_v35  ;;  %v1294_v33 = vadd.f32 9e-15, %v2930_v51  ;;  %v2934_v61 = vld [vmem:[#allocation3 + $0x70] sm:$0xff]  ;;  %v2940_v26 = vld [vmem:[#allocation3 + $0x28] sm:$0xff] }
 0x2ec   : > { %1317 = vperm.xlu1 %2013, %v1287_v57   ;;  %1307 = vperm.xlu0 %2012, %v1285_v20   ;;  %v1297_v43 = vadd.f32 9e-15, %v2934_v61  ;;  %v1296_v11 = vadd.f32 9e-15, %v2936_v5  ;;  %v2942_v55 = vld [vmem:[#allocation3 + $0x78] sm:$0xff] }
 0x2ed   : > { %v1299_v4 = vadd.f32 9e-15, %v2940_v26  ;;  %v1298_v41 = vadd.f32 9e-15, %v2942_v55 }
 0x2f0   : > { %1327 = vperm.xlu1 %2013, %v1289_v40   ;;  %1322 = vperm.xlu0 %2012, %v1288_v37  }
 0x2f4   : > { %1337 = vperm.xlu1 %2013, %v1291_v59   ;;  %1332 = vperm.xlu0 %2012, %v1290_v48  }
 0x2f8   : > { %1347 = vperm.xlu1 %2013, %v1293_v49   ;;  %1342 = vperm.xlu0 %2012, %v1292_v27  }
 0x2fc   : > { %1357 = vperm.xlu1 %2013, %v1295_v23   ;;  %1352 = vperm.xlu0 %2012, %v1294_v33  }
 0x300   : > { %1367 = vperm.xlu1 %2013, %v1297_v43   ;;  %1362 = vperm.xlu0 %2012, %v1296_v11  }
 0x304   : > { %1377 = vperm.xlu1 %2013, %v1299_v4   ;;  %1372 = vperm.xlu0 %2012, %v1298_v41  }
 0x363   : > { %v1313_v42 = vpop.permute.xlu1 %1312  ;;  %v1303_v46 = vpop.permute.xlu0 %1302 }
 0x364   : > { %2014 = vrcp.f32 %v1313_v42 }
 0x365   : > { %2016 = vrcp.f32 %v1303_v46 }
 0x367   : > { %v1318_v53 = vpop.permute.xlu1 %1317  ;;  %v1308_v50 = vpop.permute.xlu0 %1307 }
 0x368   : > { %2018 = vrcp.f32 %v1318_v53 }
 0x369   : > { %2020 = vrcp.f32 %v1308_v50 }
 0x36b   : > { %v1328_v54 = vpop.permute.xlu1 %1327  ;;  %v1323_v56 = vpop.permute.xlu0 %1322 }
 0x36c   : > { %2022 = vrcp.f32 %v1328_v54 }
 0x36d   : > { %2024 = vrcp.f32 %v1323_v56 }
 0x36f   : > { %v1338_v58 = vpop.permute.xlu1 %1337  ;;  %v1333_v6 = vpop.permute.xlu0 %1332 }
 0x370   : > { %2026 = vrcp.f32 %v1338_v58 }
 0x371   : > { %v2015_v3 = vpop.eup %2014  ;;  %2028 = vrcp.f32 %v1333_v6 }
 0x372   : > { %v2017_v18 = vpop.eup %2016  ;;  %v2947_v13 = vmul.f32 %v2015_v3, %v2898_v7 }
 0x373   : > { %v2950_v25 = vmul.f32 %v2017_v18, %v2900_v9  ;;  %v1348_v60 = vpop.permute.xlu1 %1347  ;;  %v1343_v62 = vpop.permute.xlu0 %1342 }
 0x374   : > { %v1430_v31 = vmin.f32 %v2947_v13, 0.0  ;;  %2030 = vrcp.f32 %v1348_v60  ;;  %vm1414_vm1 = vcmp.gt.f32.partialorder %v2947_v13, 0.0 }
 0x375   : > { %v2019_v0 = vpop.eup %2018  ;;  %v1428_v12 = vmin.f32 %v2950_v25, 0.0  ;;  %2032 = vrcp.f32 %v1343_v62  ;;  %vm1412_vm2 = vcmp.gt.f32.partialorder %v2950_v25, 0.0 }
 0x376   : > { %v2021_v32 = vpop.eup %2020  ;;  %v1448_v34 = vmul.f32 1.442695, %v1430_v31  ;;  %v2955_v8 = vmul.f32 %v2019_v0, %v2902_v19 }
 0x377   : > { %v1444_v44 = vmul.f32 1.442695, %v1428_v12  ;;  %v2958_v14 = vmul.f32 %v2021_v32, %v2906_v2  ;;  %v1358_v17 = vpop.permute.xlu1 %1357  ;;  %v1353_v45 = vpop.permute.xlu0 %1352 }
 0x378   : > { %2034 = vpow2.f32 %v1448_v34  ;;  %v1431_v36 = vmin.f32 %v2955_v8, 0.0  ;;  %vm1415_vm8 = vcmp.gt.f32.partialorder %v2955_v8, 0.0 }
 0x379   : > { %v2023_v63 = vpop.eup %2022  ;;  %2036 = vpow2.f32 %v1444_v44  ;;  %v1429_v39 = vmin.f32 %v2958_v14, 0.0  ;;  %vm1413_vm9 = vcmp.gt.f32.partialorder %v2958_v14, 0.0 }
 0x37a   : > { %v2025_v21 = vpop.eup %2024  ;;  %v1450_v52 = vmul.f32 1.442695, %v1431_v36  ;;  %v2963_v28 = vmul.f32 %v2023_v63, %v2910_v22  ;;  %2038 = vrcp.f32 %v1358_v17 }
 0x37b   : > { %v1446_v16 = vmul.f32 1.442695, %v1429_v39  ;;  %v2966_v7 = vmul.f32 %v2025_v21, %v2912_v24  ;;  %2040 = vrcp.f32 %v1353_v45  ;;  %v1368_v9 = vpop.permute.xlu1 %1367  ;;  %v1363_v19 = vpop.permute.xlu0 %1362 }
 0x37c   : > { %2042 = vpow2.f32 %v1450_v52  ;;  %v1433_v29 = vmin.f32 %v2963_v28, 0.0  ;;  %vm1417_vm0 = vcmp.gt.f32.partialorder %v2963_v28, 0.0 }
 0x37d   : > { %v2027_v47 = vpop.eup %2026  ;;  %2044 = vpow2.f32 %v1446_v16  ;;  %v1432_v30 = vmin.f32 %v2966_v7, 0.0  ;;  %vm1416_vm7 = vcmp.gt.f32.partialorder %v2966_v7, 0.0 }
 0x37e   : > { %v2029_v2 = vpop.eup %2028  ;;  %v1454_v57 = vmul.f32 1.442695, %v1433_v29  ;;  %v2971_v20 = vmul.f32 %v2027_v47, %v2916_v1  ;;  %2046 = vrcp.f32 %v1368_v9 }
 0x37f   : > { %v1452_v22 = vmul.f32 1.442695, %v1432_v30  ;;  %v2974_v24 = vmul.f32 %v2029_v2, %v2918_v38  ;;  %2048 = vrcp.f32 %v1363_v19  ;;  %v1378_v40 = vpop.permute.xlu1 %1377  ;;  %v1373_v59 = vpop.permute.xlu0 %1372 }
 0x380   : > { %2050 = vpow2.f32 %v1454_v57  ;;  %v1435_v37 = vmin.f32 %v2971_v20, 0.0  ;;  %vm1419_vm4 = vcmp.gt.f32.partialorder %v2971_v20, 0.0 }
 0x381   : > { %v2031_v48 = vpop.eup %2030  ;;  %2052 = vpow2.f32 %v1452_v22  ;;  %v1434_v49 = vmin.f32 %v2974_v24, 0.0  ;;  %vm1418_vm5 = vcmp.gt.f32.partialorder %v2974_v24, 0.0 }
 0x382   : > { %v2033_v27 = vpop.eup %2032  ;;  %v1458_v23 = vmul.f32 1.442695, %v1435_v37  ;;  %v2979_v1 = vmul.f32 %v2031_v48, %v2922_v15  ;;  %2054 = vrcp.f32 %v1378_v40 }
 0x383   : > { %v1456_v33 = vmul.f32 1.442695, %v1434_v49  ;;  %v2982_v38 = vmul.f32 %v2033_v27, %v2924_v10  ;;  %2056 = vrcp.f32 %v1373_v59 }
 0x384   : > { %2058 = vpow2.f32 %v1458_v23  ;;  %v1437_v43 = vmin.f32 %v2979_v1, 0.0  ;;  %vm1421_vm11 = vcmp.gt.f32.partialorder %v2979_v1, 0.0 }
 0x385   : > { %v2035_v11 = vpop.eup %2034  ;;  %2060 = vpow2.f32 %v1456_v33  ;;  %v1436_v4 = vmin.f32 %v2982_v38, 0.0  ;;  %vm1420_vm6 = vcmp.gt.f32.partialorder %v2982_v38, 0.0 }
 0x386   : > { %v2037_v41 = vpop.eup %2036  ;;  %v1693_v42 = vadd.f32 -1.0, %v2035_v11  ;;  %v1462_v46 = vmul.f32 1.442695, %v1437_v43 }
 0x387   : > { %v2039_v15 = vpop.eup %2038  ;;  %v1691_v53 = vadd.f32 -1.0, %v2037_v41  ;;  %v1460_v50 = vmul.f32 1.442695, %v1436_v4 }
 0x388   : > { %v2041_v10 = vpop.eup %2040  ;;  %v1494_v54 = vsel %vm1414_vm1, %v2947_v13, %v1693_v42  ;;  %2062 = vpow2.f32 %v1462_v46  ;;  %v2990_v56 = vmul.f32 %v2039_v15, %v2928_v35 }
 0x389   : > { %v2043_v58 = vpop.eup %2042  ;;  %1510 = vst [vmem:[%s2412_s24 + $0x10] sm:$0xff] %v1494_v54  ;;  %v1492_v6 = vsel %vm1412_vm2, %v2950_v25, %v1691_v53  ;;  %2064 = vpow2.f32 %v1460_v50  ;;  %v2995_v3 = vmul.f32 %v2041_v10, %v2930_v51 }
 0x38a   : > { %v2045_v18 = vpop.eup %2044  ;;  %1508 = vst [vmem:[%s2412_s24] sm:$0xff] %v1492_v6  ;;  %v1694_v60 = vadd.f32 -1.0, %v2043_v58  ;;  %v1439_v13 = vmin.f32 %v2990_v56, 0.0  ;;  %vm1423_vm12 = vcmp.gt.f32.partialorder %v2990_v56, 0.0 }
 0x38b   : > { %v2047_v62 = vpop.eup %2046  ;;  %v1692_v35 = vadd.f32 -1.0, %v2045_v18  ;;  %v1438_v31 = vmin.f32 %v2995_v3, 0.0  ;;  %vm1422_vm3 = vcmp.gt.f32.partialorder %v2995_v3, 0.0 }
 0x38c   : > { %v2049_v0 = vpop.eup %2048  ;;  %v1495_v25 = vsel %vm1415_vm8, %v2955_v8, %v1694_v60  ;;  %v1466_v12 = vmul.f32 1.442695, %v1439_v13  ;;  %v3004_v51 = vmul.f32 %v2047_v62, %v2934_v61 }
 0x38d   : > { %v2051_v32 = vpop.eup %2050  ;;  %1511 = vst [vmem:[%s2412_s24 + $0x18] sm:$0xff] %v1495_v25  ;;  %v1493_v34 = vsel %vm1413_vm9, %v2958_v14, %v1692_v35  ;;  %v1464_v44 = vmul.f32 1.442695, %v1438_v31  ;;  %v3009_v17 = vmul.f32 %v2049_v0, %v2936_v5 }
 0x38e   : > { %v2053_v45 = vpop.eup %2052  ;;  %1509 = vst [vmem:[%s2412_s24 + $0x8] sm:$0xff] %v1493_v34  ;;  %v1696_v36 = vadd.f32 -1.0, %v2051_v32  ;;  %2066 = vpow2.f32 %v1466_v12  ;;  %v1441_v8 = vmin.f32 %v3004_v51, 0.0  ;;  %vm1425_vm10 = vcmp.gt.f32.partialorder %v3004_v51, 0.0 }
 0x38f   : > { %v2055_v63 = vpop.eup %2054  ;;  %v1695_v61 = vadd.f32 -1.0, %v2053_v45  ;;  %2068 = vpow2.f32 %v1464_v44  ;;  %v1440_v39 = vmin.f32 %v3009_v17, 0.0  ;;  %vm1424_vm13 = vcmp.gt.f32.partialorder %v3009_v17, 0.0 }
 0x390   : > { %v2057_v14 = vpop.eup %2056  ;;  %v1497_v21 = vsel %vm1417_vm0, %v2963_v28, %v1696_v36  ;;  %v1470_v5 = vmul.f32 1.442695, %v1441_v8  ;;  %v1411_v52 = vmul.f32 %v2055_v63, %v2940_v26 }
 0x391   : > { %v2059_v16 = vpop.eup %2058  ;;  %1513 = vst [vmem:[%s2412_s24 + $0x28] sm:$0xff] %v1497_v21  ;;  %v1496_v9 = vsel %vm1416_vm7, %v2966_v7, %v1695_v61  ;;  %v1468_v19 = vmul.f32 1.442695, %v1440_v39  ;;  %v1409_v29 = vmul.f32 %v2057_v14, %v2942_v55 }
 0x392   : > { %v2061_v47 = vpop.eup %2060  ;;  %1512 = vst [vmem:[%s2412_s24 + $0x20] sm:$0xff] %v1496_v9  ;;  %v1698_v30 = vadd.f32 -1.0, %v2059_v16  ;;  %2070 = vpow2.f32 %v1470_v5  ;;  %v1443_v2 = vmin.f32 %v1411_v52, 0.0  ;;  %vm1427_vm14 = vcmp.gt.f32.partialorder %v1411_v52, 0.0 }
 0x393   : > { %v1697_v28 = vadd.f32 -1.0, %v2061_v47  ;;  %2072 = vpow2.f32 %v1468_v19  ;;  %v1442_v57 = vmin.f32 %v1409_v29, 0.0  ;;  %vm1426_vm15 = vcmp.gt.f32.partialorder %v1409_v29, 0.0 }
 0x394   : > { %v1499_v26 = vsel %vm1419_vm4, %v2971_v20, %v1698_v30  ;;  %v1474_v7 = vmul.f32 1.442695, %v1443_v2 }
 0x395   : > { %v2063_v22 = vpop.eup %2062  ;;  %1515 = vst [vmem:[%s2412_s24 + $0x38] sm:$0xff] %v1499_v26  ;;  %v1498_v55 = vsel %vm1418_vm5, %v2974_v24, %v1697_v28  ;;  %v1472_v40 = vmul.f32 1.442695, %v1442_v57 }
 0x396   : > { %v2065_v37 = vpop.eup %2064  ;;  %1514 = vst [vmem:[%s2412_s24 + $0x30] sm:$0xff] %v1498_v55  ;;  %v1700_v59 = vadd.f32 -1.0, %v2063_v22  ;;  %2074 = vpow2.f32 %v1474_v7 }
 0x397   : > { %v1699_v48 = vadd.f32 -1.0, %v2065_v37  ;;  %2076 = vpow2.f32 %v1472_v40 }
 0x398   : > { %v1501_v20 = vsel %vm1421_vm11, %v2979_v1, %v1700_v59 }
 0x399   : > { %1517 = vst [vmem:[%s2412_s24 + $0x48] sm:$0xff] %v1501_v20  ;;  %v1500_v49 = vsel %vm1420_vm6, %v2982_v38, %v1699_v48 }
 0x39a   : > { %1516 = vst [vmem:[%s2412_s24 + $0x40] sm:$0xff] %v1500_v49 }
 0x39b   : > { %v2067_v24 = vpop.eup %2066 }
 0x39c   : > { %v2069_v27 = vpop.eup %2068  ;;  %v1702_v23 = vadd.f32 -1.0, %v2067_v24 }
 0x39d   : > { %v1701_v33 = vadd.f32 -1.0, %v2069_v27 }
 0x39e   : > { %v1503_v43 = vsel %vm1423_vm12, %v2990_v56, %v1702_v23 }
 0x39f   : > { %v2071_v1 = vpop.eup %2070  ;;  %1519 = vst [vmem:[%s2412_s24 + $0x58] sm:$0xff] %v1503_v43  ;;  %v1502_v11 = vsel %vm1422_vm3, %v2995_v3, %v1701_v33 }
 0x3a0   : > { %v2073_v4 = vpop.eup %2072  ;;  %1518 = vst [vmem:[%s2412_s24 + $0x50] sm:$0xff] %v1502_v11  ;;  %v1704_v38 = vadd.f32 -1.0, %v2071_v1 }
 0x3a1   : > { %v1703_v41 = vadd.f32 -1.0, %v2073_v4 }
 0x3a2   : > { %v1505_v42 = vsel %vm1425_vm10, %v3004_v51, %v1704_v38 }
 0x3a3   : > { %v2075_v46 = vpop.eup %2074  ;;  %1521 = vst [vmem:[%s2412_s24 + $0x68] sm:$0xff] %v1505_v42  ;;  %v1504_v15 = vsel %vm1424_vm13, %v3009_v17, %v1703_v41 }
 0x3a4   : > { %v2077_v53 = vpop.eup %2076  ;;  %1520 = vst [vmem:[%s2412_s24 + $0x60] sm:$0xff] %v1504_v15  ;;  %v1706_v50 = vadd.f32 -1.0, %v2075_v46 }
 0x3a5   : > { %v1705_v10 = vadd.f32 -1.0, %v2077_v53 }
 0x3a6   : > { %v1507_v54 = vsel %vm1427_vm14, %v1411_v52, %v1706_v50 }
 0x3a7   : > { %1523 = vst [vmem:[%s2412_s24 + $0x78] sm:$0xff] %v1507_v54  ;;  %v1506_v56 = vsel %vm1426_vm15, %v1409_v29, %v1705_v10 }
 0x3a8   : > { %1522 = vst [vmem:[%s2412_s24 + $0x70] sm:$0xff] %v1506_v56 }
 0x3a9 PF: > { %s1713_s2 = sshll.u32 %s2214_s22, 11  ;;  %s3197_s30 = sld [smem:[#allocation16_spill]] }
 0x3aa   : > { %s1538_s26 = sshll.u32 %s2412_s24, 4  ;;  %s3198_s5 = sand.u32 1, %s2190_s16   ;;  %s3055_s26 = int_to_ptr.vmem [resolvable:$true] %s1538_s26 }
 0x3ab   : > { %s3059_s8 = scalar_lea.sflag [#allocation6], %s3198_s5  ;;  %s2106_s9 = scalar_lea.vmem %s3055_s26, 2048 }
 0x3ac   : > { %p2107_p10 = scmp.ne.s32.totalorder %s3055_s26, %s2106_s9  ;;  %s2237_s22 = smov [#allocation7]  }
 0x3ad   : > { %s2110_s4 = sshll.u32 %s2237_s22, 4  ;;  %s2111_s4 = int_to_ptr.vmem [resolvable:$false] %s2110_s4 }
 0x3ae   : > { %p2108_p11 = pnand %p2107_p10, %p2347_p12  ;;  %s2112_s28 = scalar_lea.vmem %s2111_s4, 4096 }
 0x3af   : > { %s3052_s27 = scalar_lea.hbm %s3197_s30, %s1713_s2  ;;  %p2113_p0 = scmp.lt.s32.totalorder %s3055_s26, %s2111_s4 }
 0x3b0   : > { %p2109_p13 = pneg %p2108_p11  ;;  %p2114_p3 = scmp.lt.s32.totalorder %s2112_s28, %s2106_s9 }
 0x3b2   : > { %p2115_p1 = por %p2114_p3, %p2113_p0 }
 0x3b4   : > { %p2116_p5 = pnand %p2115_p1, %p2109_p13 }
 0x3b6   : > { %2119 = shalt.err (!%p2116_p5)
}
 0x3b7   : > { %s2120_s24 = scalar_lea.hbm %s3052_s27, 2048  ;;  %s2124_s10 = scalar_lea.hbm %s3197_s30, 4096 }
 0x3b8   : > { %p2121_p4 = scmp.ne.s32.totalorder %s3052_s27, %s2120_s24  ;;  %p2125_p8 = scmp.lt.s32.totalorder %s3052_s27, %s3197_s30 }
 0x3b9   : > { %p2126_p9 = scmp.lt.s32.totalorder %s2124_s10, %s2120_s24 }
 0x3ba   : > { %p2122_p6 = pnand %p2121_p4, %p2347_p12 }
 0x3bb   : > { %p2127_p10 = por %p2126_p9, %p2125_p8 }
 0x3bc   : > { %p2123_p7 = pneg %p2122_p6 }
 0x3be   : > { %p2128_p11 = pnand %p2127_p10, %p2123_p7 }
 0x3c0   : > { %2131 = shalt.err (!%p2128_p11)
}
 0x3c1   : > { %s2238_s29 = smov 128   ;;  %s2239_s2 = smov 8  }
 0x3c2   : > { %1836 = dma.vmem_to_hbm [thread:$0]  (%p2347_p12), %s3055_s26, 2048, %s3052_s27, %s3059_s8, %s2238_s29, %s2238_s29, %s2239_s2  }
 0x3c3 PF: > { %p1847_p13 = scmp.ge.s32.totalorder %s2226_s25, 2  ;;  %s1553_s21 = sand.u32 1, %s2186_s15  }
 0x3c4   : > { %s1554_s13 = scalar_lea.sflag [#allocation6], %s1553_s21 }
 0x3c5   : > { %p1843_p0 = pnand %p1847_p13, %p2360_p2 }
 0x3c7   : > { %p1844_p3 = pneg %p1843_p0 }
 0x3c9   : > { %2181 = dma.done.wait (%p1844_p3), %s1554_s13, 2048  }
 0x3ca   : > { %2183 = vsyncadd (%p1844_p3), %s1554_s13, 4294965248  ;;  %s20_s25 = sadd.s32 1, %s2226_s25   ;;  %s3199_s11 = sld [smem:[#allocation10_spill]] }
 0x3cb   : > { %p17_p1 = scmp.ge.s32.totalorder %s20_s25, 6   ;;  %s3200_s20 = sld [smem:[#allocation14_spill]] }
 0x3cc   : > { %s3201_s22 = sld [smem:[#allocation11_spill]]  ;;  %s3204_s15 = smov %s2190_s16 }
 0x3cd   : > { %s3202_s27 = sld [smem:[#allocation12_spill]]  ;;  %s3205_s16 = smov %s2194_s17 }
 0x3ce   : > { %s3203_s24 = sld [smem:[#allocation13_spill]]  ;;  %s3206_s17 = smov %s2352_s12 }
 0x3cf   : > { %s3207_s18 = smov %s2202_s19  ;;  %s3209_s21 = smov %s2218_s23 }
 0x3d0   : > { %s3208_s19 = smov %s3199_s11  ;;  %19 = sbr.rel (!%p17_p1) target bundleno = 12 (0xc), region = 98 }
 0x3d3   : > { %s3210_s23 = smov %s3202_s27 }
 0x3d5   :  { %1559 = vsyncpa [#allocation5], 1 }
 0x3d6   :  { %1561 = vsyncpa [#allocation5 + $0x1], 1 }
 0x3d7   :  { %1562 = vsyncpa [#allocation6], 1 }
 0x3d8   :  { %1564 = vsyncpa [#allocation6 + $0x1], 1 }

</bundles_post_ra>
